<compile_context>
chip_gen: v5e
topology: v5e:2x2
jax: 0.10.0
libtpu: 0.0.40
codegen_flags: <defaults>
</compile_context>

<pallas_src>
import functools

import jax
import jax.numpy as jnp
from jax.experimental import pallas as pl
from jax.experimental.pallas import tpu as pltpu


def _upsample_conv_kernel(xb_ref, we_ref, wo_ref, o_ref):
    """One (batch, row-block) step of conv3x3 with folded pixel-shuffle split.

    xb_ref: (1, 1, tH+2, W+2, Cin)  bf16  input rows incl. 1-row/col halo
    we_ref: (3, 3, Cin, Cin)        bf16  taps for even output rows (i = 0)
    wo_ref: (3, 3, Cin, Cin)        bf16  taps for odd  output rows (i = 1)
    o_ref:  (1, 1, tH, 2, W, Cin)   f32   indexed as (row, parity, col, j*Cps+c)
    """
    tH = o_ref.shape[2]
    W = o_ref.shape[4]
    Cin = o_ref.shape[5]

    xb = xb_ref[0, 0]                                    # (tH+2, W+2, Cin) bf16

    # Hoist the dx (sublane-axis) shifts: 3 column views, built once, then
    # reshaped once each so every tap matmul is a plain 2-D MXU call and the
    # dy shift becomes an aligned (multiple-of-W) row offset.
    xcols = [xb[:, dx:dx + W, :].reshape((tH + 2) * W, Cin) for dx in range(3)]

    acc_e = None   # even output rows (pixel-shuffle i = 0)
    acc_o = None   # odd  output rows (pixel-shuffle i = 1)
    for dy in range(3):
        base = dy * W
        for dx in range(3):
            a = xcols[dx][base:base + tH * W]            # (tH*W, Cin) bf16
            pe = jnp.dot(a, we_ref[dy, dx], preferred_element_type=jnp.float32)
            po = jnp.dot(a, wo_ref[dy, dx], preferred_element_type=jnp.float32)
            if acc_e is None:
                acc_e, acc_o = pe, po                    # init from first tap
            else:
                acc_e = acc_e + pe
                acc_o = acc_o + po

    o_ref[0, 0, :, 0, :, :] = acc_e.reshape(tH, W, Cin).astype(o_ref.dtype)
    o_ref[0, 0, :, 1, :, :] = acc_o.reshape(tH, W, Cin).astype(o_ref.dtype)


@functools.partial(jax.jit, static_argnames=("tile_h",))
def upsample(x, w_hwio, *, tile_h=8):
    """Upsample forward pass, channels-last.

    x:      (N, H, W, Cin)        float32
    w_hwio: (3, 3, Cin, 2*Cin)    float32  (HWIO == torch weight.permute(2,3,1,0))
    return: (N, 2H, 2W, Cin // 2) float32
    """
    N, H, W, Cin = x.shape
    Cout = w_hwio.shape[-1]
    assert Cout == 2 * Cin and Cin % 2 == 0, "PixelShuffle(2) needs Cout % 4 == 0"
    Cps = Cout // 4                                      # channels after shuffle

    if H % tile_h != 0:
        tile_h = H
    nblk = H // tile_h

    # Fold PixelShuffle into the conv: conv channel (c*4 + i*2 + j) lands at
    # output pixel (2h+i, 2w+j, c).  Split by row parity i; order each half as
    # (j, c) so the kernel output slab is directly lane-contiguous.
    c_idx = jnp.arange(Cps)
    perm_e = jnp.concatenate([c_idx * 4 + 0 + j for j in range(2)])   # i = 0
    perm_o = jnp.concatenate([c_idx * 4 + 2 + j for j in range(2)])   # i = 1
    w_even = w_hwio[..., perm_e].astype(jnp.bfloat16)    # (3, 3, Cin, 2*Cps) == (3,3,Cin,Cin)
    w_odd = w_hwio[..., perm_o].astype(jnp.bfloat16)

    # Pad once in HBM and materialize overlapping row blocks (1-row halo each
    # side) so the kernel does no in-VMEM padding / concat and BlockSpecs stay
    # plain Blocked.
    xp = jnp.pad(x, ((0, 0), (1, 1), (1, 1), (0, 0)))
    xb = jnp.stack(
        [xp[:, i * tile_h:i * tile_h + tile_h + 2] for i in range(nblk)], axis=1
    ).astype(jnp.bfloat16)                               # (N, nblk, tH+2, W+2, Cin)

    out6 = pl.pallas_call(
        _upsample_conv_kernel,
        out_shape=jax.ShapeDtypeStruct((N, nblk, tile_h, 2, W, Cin), x.dtype),
        grid=(N, nblk),
        in_specs=[
            pl.BlockSpec((1, 1, tile_h + 2, W + 2, Cin),
                         lambda n, b: (n, b, 0, 0, 0)),
            pl.BlockSpec((3, 3, Cin, Cin), lambda n, b: (0, 0, 0, 0)),
            pl.BlockSpec((3, 3, Cin, Cin), lambda n, b: (0, 0, 0, 0)),
        ],
        out_specs=pl.BlockSpec((1, 1, tile_h, 2, W, Cin),
                               lambda n, b: (n, b, 0, 0, 0, 0)),
        compiler_params=pltpu.CompilerParams(
            dimension_semantics=("parallel", "parallel"),
            # Re-derive per tile; kept below v7x's 64 MiB physical VMEM.
            vmem_limit_bytes=48 * 1024 * 1024,
        ),
    )(xb, w_even, w_odd)

    # (N, nblk, tH, 2, W, 2*Cps) -> (N, H, 2, W, 2*Cps) -> (N, 2H, 2W, Cps)
    # Both reshapes are pure contiguous relabelings (free).
    return out6.reshape(N, H, 2, W, Cin).reshape(N, 2 * H, 2 * W, Cps)


def _reference(x, w_hwio):
    """Pure-JAX NHWC reference: conv3x3 (pad 1, no bias) + PixelShuffle(2)."""
    y = jax.lax.conv_general_dilated(
        x, w_hwio, window_strides=(1, 1), padding=((1, 1), (1, 1)),
        dimension_numbers=("NHWC", "HWIO", "NHWC"))
    N, H, W, Co = y.shape
    Cps = Co // 4
    y = y.reshape(N, H, W, Cps, 2, 2)                    # (..., c, i, j) — torch grouping
    y = jnp.transpose(y, (0, 1, 4, 2, 5, 3))             # N, H, i, W, j, c
    return y.reshape(N, 2 * H, 2 * W, Cps)


if __name__ == "__main__":
    # Small deterministic config: n_feat=4, batch=2, 16x16 spatial.
    n_feat, N, H, W = 4, 2, 16, 16

    key = jax.random.PRNGKey(0)
    kx, kw = jax.random.split(key)
    x = jax.random.normal(kx, (N, H, W, n_feat), dtype=jnp.float32)
    w = jax.random.normal(kw, (3, 3, n_feat, 2 * n_feat), dtype=jnp.float32) * 0.1

    out = upsample(x, w, tile_h=8)
    out = jax.block_until_ready(out)

    ref = _reference(x, w)
    assert out.shape == (N, 2 * H, 2 * W, n_feat // 2), out.shape
    err = jnp.max(jnp.abs(out - ref))
    # bf16 MXU operands (f32 accumulation) -> loosened tolerance vs f32 reference.
    assert jnp.allclose(out, ref, atol=5e-2, rtol=5e-2), f"max abs err {err}"
    print("KERNEL_OK")
</pallas_src>

<mosaic_0001>
module attributes {stable_mosaic.version = 11 : i64} {
  func.func @_upsample_conv_kernel(%arg0: i32, %arg1: i32, %arg2: memref<1x1x10x18x4xbf16, #tpu.memory_space<vmem>>, %arg3: memref<3x3x4x4xbf16, #tpu.memory_space<vmem>>, %arg4: memref<3x3x4x4xbf16, #tpu.memory_space<vmem>>, %arg5: memref<1x1x8x2x16x4xf32, #tpu.memory_space<vmem>>) attributes {dimension_semantics = [#tpu.dimension_semantics<parallel>, #tpu.dimension_semantics<parallel>], iteration_bounds = array<i64: 2, 2>, scalar_prefetch = 0 : i64, scratch_operands = 0 : i64, tpu.core_type = #tpu.core_type<tc>, window_params = [{transform_indices = @transform_0, window_bounds = array<i64: 1, 1, 10, 18, 4>}, {pipeline_mode = #tpu.pipeline_mode<synchronous>, transform_indices = @transform_1, window_bounds = array<i64: 3, 3, 4, 4>}, {pipeline_mode = #tpu.pipeline_mode<synchronous>, transform_indices = @transform_2, window_bounds = array<i64: 3, 3, 4, 4>}, {transform_indices = @transform_3, window_bounds = array<i64: 1, 1, 8, 2, 16, 4>}]} {
    %c0 = arith.constant 0 : index
    %c0_0 = arith.constant 0 : index
    %c0_1 = arith.constant 0 : index
    %c0_2 = arith.constant 0 : index
    %c0_3 = arith.constant 0 : index
    %0 = vector.load %arg2[%c0, %c0_0, %c0_1, %c0_2, %c0_3] : memref<1x1x10x18x4xbf16, #tpu.memory_space<vmem>>, vector<1x1x10x18x4xbf16>
    %1 = vector.shape_cast %0 : vector<1x1x10x18x4xbf16> to vector<10x18x4xbf16>
    %2 = vector.extract_strided_slice %1 {offsets = [0, 0, 0], sizes = [10, 16, 4], strides = [1, 1, 1]} : vector<10x18x4xbf16> to vector<10x16x4xbf16>
    %3 = vector.shape_cast %2 : vector<10x16x4xbf16> to vector<160x4xbf16>
    %4 = vector.extract_strided_slice %1 {offsets = [0, 1, 0], sizes = [10, 16, 4], strides = [1, 1, 1]} : vector<10x18x4xbf16> to vector<10x16x4xbf16>
    %5 = vector.shape_cast %4 : vector<10x16x4xbf16> to vector<160x4xbf16>
    %6 = vector.extract_strided_slice %1 {offsets = [0, 2, 0], sizes = [10, 16, 4], strides = [1, 1, 1]} : vector<10x18x4xbf16> to vector<10x16x4xbf16>
    %7 = vector.shape_cast %6 : vector<10x16x4xbf16> to vector<160x4xbf16>
    %8 = vector.extract_strided_slice %3 {offsets = [0, 0], sizes = [128, 4], strides = [1, 1]} : vector<160x4xbf16> to vector<128x4xbf16>
    %c0_4 = arith.constant 0 : index
    %c0_5 = arith.constant 0 : index
    %c0_6 = arith.constant 0 : index
    %c0_7 = arith.constant 0 : index
    %9 = vector.load %arg3[%c0_4, %c0_5, %c0_6, %c0_7] : memref<3x3x4x4xbf16, #tpu.memory_space<vmem>>, vector<1x1x4x4xbf16>
    %10 = vector.shape_cast %9 : vector<1x1x4x4xbf16> to vector<4x4xbf16>
    %cst = arith.constant dense<0.000000e+00> : vector<128x4xf32>
    %11 = tpu.matmul %8, %10, %cst {dimension_numbers = #tpu.dot_dimension_numbers<[1], [0], [0], [1], [0, 0, 1, 1], [], []>} : vector<128x4xbf16>, vector<4x4xbf16>, vector<128x4xf32> -> vector<128x4xf32>
    %c0_8 = arith.constant 0 : index
    %c0_9 = arith.constant 0 : index
    %c0_10 = arith.constant 0 : index
    %c0_11 = arith.constant 0 : index
    %12 = vector.load %arg4[%c0_8, %c0_9, %c0_10, %c0_11] : memref<3x3x4x4xbf16, #tpu.memory_space<vmem>>, vector<1x1x4x4xbf16>
    %13 = vector.shape_cast %12 : vector<1x1x4x4xbf16> to vector<4x4xbf16>
    %cst_12 = arith.constant dense<0.000000e+00> : vector<128x4xf32>
    %14 = tpu.matmul %8, %13, %cst_12 {dimension_numbers = #tpu.dot_dimension_numbers<[1], [0], [0], [1], [0, 0, 1, 1], [], []>} : vector<128x4xbf16>, vector<4x4xbf16>, vector<128x4xf32> -> vector<128x4xf32>
    %15 = vector.extract_strided_slice %5 {offsets = [0, 0], sizes = [128, 4], strides = [1, 1]} : vector<160x4xbf16> to vector<128x4xbf16>
    %c0_13 = arith.constant 0 : index
    %c1 = arith.constant 1 : index
    %c0_14 = arith.constant 0 : index
    %c0_15 = arith.constant 0 : index
    %16 = vector.load %arg3[%c0_13, %c1, %c0_14, %c0_15] : memref<3x3x4x4xbf16, #tpu.memory_space<vmem>>, vector<1x1x4x4xbf16>
    %17 = vector.shape_cast %16 : vector<1x1x4x4xbf16> to vector<4x4xbf16>
    %cst_16 = arith.constant dense<0.000000e+00> : vector<128x4xf32>
    %18 = tpu.matmul %15, %17, %cst_16 {dimension_numbers = #tpu.dot_dimension_numbers<[1], [0], [0], [1], [0, 0, 1, 1], [], []>} : vector<128x4xbf16>, vector<4x4xbf16>, vector<128x4xf32> -> vector<128x4xf32>
    %c0_17 = arith.constant 0 : index
    %c1_18 = arith.constant 1 : index
    %c0_19 = arith.constant 0 : index
    %c0_20 = arith.constant 0 : index
    %19 = vector.load %arg4[%c0_17, %c1_18, %c0_19, %c0_20] : memref<3x3x4x4xbf16, #tpu.memory_space<vmem>>, vector<1x1x4x4xbf16>
    %20 = vector.shape_cast %19 : vector<1x1x4x4xbf16> to vector<4x4xbf16>
    %cst_21 = arith.constant dense<0.000000e+00> : vector<128x4xf32>
    %21 = tpu.matmul %15, %20, %cst_21 {dimension_numbers = #tpu.dot_dimension_numbers<[1], [0], [0], [1], [0, 0, 1, 1], [], []>} : vector<128x4xbf16>, vector<4x4xbf16>, vector<128x4xf32> -> vector<128x4xf32>
    %22 = arith.addf %11, %18 : vector<128x4xf32>
    %23 = arith.addf %14, %21 : vector<128x4xf32>
    %24 = vector.extract_strided_slice %7 {offsets = [0, 0], sizes = [128, 4], strides = [1, 1]} : vector<160x4xbf16> to vector<128x4xbf16>
    %c0_22 = arith.constant 0 : index
    %c2 = arith.constant 2 : index
    %c0_23 = arith.constant 0 : index
    %c0_24 = arith.constant 0 : index
    %25 = vector.load %arg3[%c0_22, %c2, %c0_23, %c0_24] : memref<3x3x4x4xbf16, #tpu.memory_space<vmem>>, vector<1x1x4x4xbf16>
    %26 = vector.shape_cast %25 : vector<1x1x4x4xbf16> to vector<4x4xbf16>
    %cst_25 = arith.constant dense<0.000000e+00> : vector<128x4xf32>
    %27 = tpu.matmul %24, %26, %cst_25 {dimension_numbers = #tpu.dot_dimension_numbers<[1], [0], [0], [1], [0, 0, 1, 1], [], []>} : vector<128x4xbf16>, vector<4x4xbf16>, vector<128x4xf32> -> vector<128x4xf32>
    %c0_26 = arith.constant 0 : index
    %c2_27 = arith.constant 2 : index
    %c0_28 = arith.constant 0 : index
    %c0_29 = arith.constant 0 : index
    %28 = vector.load %arg4[%c0_26, %c2_27, %c0_28, %c0_29] : memref<3x3x4x4xbf16, #tpu.memory_space<vmem>>, vector<1x1x4x4xbf16>
    %29 = vector.shape_cast %28 : vector<1x1x4x4xbf16> to vector<4x4xbf16>
    %cst_30 = arith.constant dense<0.000000e+00> : vector<128x4xf32>
    %30 = tpu.matmul %24, %29, %cst_30 {dimension_numbers = #tpu.dot_dimension_numbers<[1], [0], [0], [1], [0, 0, 1, 1], [], []>} : vector<128x4xbf16>, vector<4x4xbf16>, vector<128x4xf32> -> vector<128x4xf32>
    %31 = arith.addf %22, %27 : vector<128x4xf32>
    %32 = arith.addf %23, %30 : vector<128x4xf32>
    %33 = vector.extract_strided_slice %3 {offsets = [16, 0], sizes = [128, 4], strides = [1, 1]} : vector<160x4xbf16> to vector<128x4xbf16>
    %c1_31 = arith.constant 1 : index
    %c0_32 = arith.constant 0 : index
    %c0_33 = arith.constant 0 : index
    %c0_34 = arith.constant 0 : index
    %34 = vector.load %arg3[%c1_31, %c0_32, %c0_33, %c0_34] : memref<3x3x4x4xbf16, #tpu.memory_space<vmem>>, vector<1x1x4x4xbf16>
    %35 = vector.shape_cast %34 : vector<1x1x4x4xbf16> to vector<4x4xbf16>
    %cst_35 = arith.constant dense<0.000000e+00> : vector<128x4xf32>
    %36 = tpu.matmul %33, %35, %cst_35 {dimension_numbers = #tpu.dot_dimension_numbers<[1], [0], [0], [1], [0, 0, 1, 1], [], []>} : vector<128x4xbf16>, vector<4x4xbf16>, vector<128x4xf32> -> vector<128x4xf32>
    %c1_36 = arith.constant 1 : index
    %c0_37 = arith.constant 0 : index
    %c0_38 = arith.constant 0 : index
    %c0_39 = arith.constant 0 : index
    %37 = vector.load %arg4[%c1_36, %c0_37, %c0_38, %c0_39] : memref<3x3x4x4xbf16, #tpu.memory_space<vmem>>, vector<1x1x4x4xbf16>
    %38 = vector.shape_cast %37 : vector<1x1x4x4xbf16> to vector<4x4xbf16>
    %cst_40 = arith.constant dense<0.000000e+00> : vector<128x4xf32>
    %39 = tpu.matmul %33, %38, %cst_40 {dimension_numbers = #tpu.dot_dimension_numbers<[1], [0], [0], [1], [0, 0, 1, 1], [], []>} : vector<128x4xbf16>, vector<4x4xbf16>, vector<128x4xf32> -> vector<128x4xf32>
    %40 = arith.addf %31, %36 : vector<128x4xf32>
    %41 = arith.addf %32, %39 : vector<128x4xf32>
    %42 = vector.extract_strided_slice %5 {offsets = [16, 0], sizes = [128, 4], strides = [1, 1]} : vector<160x4xbf16> to vector<128x4xbf16>
    %c1_41 = arith.constant 1 : index
    %c1_42 = arith.constant 1 : index
    %c0_43 = arith.constant 0 : index
    %c0_44 = arith.constant 0 : index
    %43 = vector.load %arg3[%c1_41, %c1_42, %c0_43, %c0_44] : memref<3x3x4x4xbf16, #tpu.memory_space<vmem>>, vector<1x1x4x4xbf16>
    %44 = vector.shape_cast %43 : vector<1x1x4x4xbf16> to vector<4x4xbf16>
    %cst_45 = arith.constant dense<0.000000e+00> : vector<128x4xf32>
    %45 = tpu.matmul %42, %44, %cst_45 {dimension_numbers = #tpu.dot_dimension_numbers<[1], [0], [0], [1], [0, 0, 1, 1], [], []>} : vector<128x4xbf16>, vector<4x4xbf16>, vector<128x4xf32> -> vector<128x4xf32>
    %c1_46 = arith.constant 1 : index
    %c1_47 = arith.constant 1 : index
    %c0_48 = arith.constant 0 : index
    %c0_49 = arith.constant 0 : index
    %46 = vector.load %arg4[%c1_46, %c1_47, %c0_48, %c0_49] : memref<3x3x4x4xbf16, #tpu.memory_space<vmem>>, vector<1x1x4x4xbf16>
    %47 = vector.shape_cast %46 : vector<1x1x4x4xbf16> to vector<4x4xbf16>
    %cst_50 = arith.constant dense<0.000000e+00> : vector<128x4xf32>
    %48 = tpu.matmul %42, %47, %cst_50 {dimension_numbers = #tpu.dot_dimension_numbers<[1], [0], [0], [1], [0, 0, 1, 1], [], []>} : vector<128x4xbf16>, vector<4x4xbf16>, vector<128x4xf32> -> vector<128x4xf32>
    %49 = arith.addf %40, %45 : vector<128x4xf32>
    %50 = arith.addf %41, %48 : vector<128x4xf32>
    %51 = vector.extract_strided_slice %7 {offsets = [16, 0], sizes = [128, 4], strides = [1, 1]} : vector<160x4xbf16> to vector<128x4xbf16>
    %c1_51 = arith.constant 1 : index
    %c2_52 = arith.constant 2 : index
    %c0_53 = arith.constant 0 : index
    %c0_54 = arith.constant 0 : index
    %52 = vector.load %arg3[%c1_51, %c2_52, %c0_53, %c0_54] : memref<3x3x4x4xbf16, #tpu.memory_space<vmem>>, vector<1x1x4x4xbf16>
    %53 = vector.shape_cast %52 : vector<1x1x4x4xbf16> to vector<4x4xbf16>
    %cst_55 = arith.constant dense<0.000000e+00> : vector<128x4xf32>
    %54 = tpu.matmul %51, %53, %cst_55 {dimension_numbers = #tpu.dot_dimension_numbers<[1], [0], [0], [1], [0, 0, 1, 1], [], []>} : vector<128x4xbf16>, vector<4x4xbf16>, vector<128x4xf32> -> vector<128x4xf32>
    %c1_56 = arith.constant 1 : index
    %c2_57 = arith.constant 2 : index
    %c0_58 = arith.constant 0 : index
    %c0_59 = arith.constant 0 : index
    %55 = vector.load %arg4[%c1_56, %c2_57, %c0_58, %c0_59] : memref<3x3x4x4xbf16, #tpu.memory_space<vmem>>, vector<1x1x4x4xbf16>
    %56 = vector.shape_cast %55 : vector<1x1x4x4xbf16> to vector<4x4xbf16>
    %cst_60 = arith.constant dense<0.000000e+00> : vector<128x4xf32>
    %57 = tpu.matmul %51, %56, %cst_60 {dimension_numbers = #tpu.dot_dimension_numbers<[1], [0], [0], [1], [0, 0, 1, 1], [], []>} : vector<128x4xbf16>, vector<4x4xbf16>, vector<128x4xf32> -> vector<128x4xf32>
    %58 = arith.addf %49, %54 : vector<128x4xf32>
    %59 = arith.addf %50, %57 : vector<128x4xf32>
    %60 = vector.extract_strided_slice %3 {offsets = [32, 0], sizes = [128, 4], strides = [1, 1]} : vector<160x4xbf16> to vector<128x4xbf16>
    %c2_61 = arith.constant 2 : index
    %c0_62 = arith.constant 0 : index
    %c0_63 = arith.constant 0 : index
    %c0_64 = arith.constant 0 : index
    %61 = vector.load %arg3[%c2_61, %c0_62, %c0_63, %c0_64] : memref<3x3x4x4xbf16, #tpu.memory_space<vmem>>, vector<1x1x4x4xbf16>
    %62 = vector.shape_cast %61 : vector<1x1x4x4xbf16> to vector<4x4xbf16>
    %cst_65 = arith.constant dense<0.000000e+00> : vector<128x4xf32>
    %63 = tpu.matmul %60, %62, %cst_65 {dimension_numbers = #tpu.dot_dimension_numbers<[1], [0], [0], [1], [0, 0, 1, 1], [], []>} : vector<128x4xbf16>, vector<4x4xbf16>, vector<128x4xf32> -> vector<128x4xf32>
    %c2_66 = arith.constant 2 : index
    %c0_67 = arith.constant 0 : index
    %c0_68 = arith.constant 0 : index
    %c0_69 = arith.constant 0 : index
    %64 = vector.load %arg4[%c2_66, %c0_67, %c0_68, %c0_69] : memref<3x3x4x4xbf16, #tpu.memory_space<vmem>>, vector<1x1x4x4xbf16>
    %65 = vector.shape_cast %64 : vector<1x1x4x4xbf16> to vector<4x4xbf16>
    %cst_70 = arith.constant dense<0.000000e+00> : vector<128x4xf32>
    %66 = tpu.matmul %60, %65, %cst_70 {dimension_numbers = #tpu.dot_dimension_numbers<[1], [0], [0], [1], [0, 0, 1, 1], [], []>} : vector<128x4xbf16>, vector<4x4xbf16>, vector<128x4xf32> -> vector<128x4xf32>
    %67 = arith.addf %58, %63 : vector<128x4xf32>
    %68 = arith.addf %59, %66 : vector<128x4xf32>
    %69 = vector.extract_strided_slice %5 {offsets = [32, 0], sizes = [128, 4], strides = [1, 1]} : vector<160x4xbf16> to vector<128x4xbf16>
    %c2_71 = arith.constant 2 : index
    %c1_72 = arith.constant 1 : index
    %c0_73 = arith.constant 0 : index
    %c0_74 = arith.constant 0 : index
    %70 = vector.load %arg3[%c2_71, %c1_72, %c0_73, %c0_74] : memref<3x3x4x4xbf16, #tpu.memory_space<vmem>>, vector<1x1x4x4xbf16>
    %71 = vector.shape_cast %70 : vector<1x1x4x4xbf16> to vector<4x4xbf16>
    %cst_75 = arith.constant dense<0.000000e+00> : vector<128x4xf32>
    %72 = tpu.matmul %69, %71, %cst_75 {dimension_numbers = #tpu.dot_dimension_numbers<[1], [0], [0], [1], [0, 0, 1, 1], [], []>} : vector<128x4xbf16>, vector<4x4xbf16>, vector<128x4xf32> -> vector<128x4xf32>
    %c2_76 = arith.constant 2 : index
    %c1_77 = arith.constant 1 : index
    %c0_78 = arith.constant 0 : index
    %c0_79 = arith.constant 0 : index
    %73 = vector.load %arg4[%c2_76, %c1_77, %c0_78, %c0_79] : memref<3x3x4x4xbf16, #tpu.memory_space<vmem>>, vector<1x1x4x4xbf16>
    %74 = vector.shape_cast %73 : vector<1x1x4x4xbf16> to vector<4x4xbf16>
    %cst_80 = arith.constant dense<0.000000e+00> : vector<128x4xf32>
    %75 = tpu.matmul %69, %74, %cst_80 {dimension_numbers = #tpu.dot_dimension_numbers<[1], [0], [0], [1], [0, 0, 1, 1], [], []>} : vector<128x4xbf16>, vector<4x4xbf16>, vector<128x4xf32> -> vector<128x4xf32>
    %76 = arith.addf %67, %72 : vector<128x4xf32>
    %77 = arith.addf %68, %75 : vector<128x4xf32>
    %78 = vector.extract_strided_slice %7 {offsets = [32, 0], sizes = [128, 4], strides = [1, 1]} : vector<160x4xbf16> to vector<128x4xbf16>
    %c2_81 = arith.constant 2 : index
    %c2_82 = arith.constant 2 : index
    %c0_83 = arith.constant 0 : index
    %c0_84 = arith.constant 0 : index
    %79 = vector.load %arg3[%c2_81, %c2_82, %c0_83, %c0_84] : memref<3x3x4x4xbf16, #tpu.memory_space<vmem>>, vector<1x1x4x4xbf16>
    %80 = vector.shape_cast %79 : vector<1x1x4x4xbf16> to vector<4x4xbf16>
    %cst_85 = arith.constant dense<0.000000e+00> : vector<128x4xf32>
    %81 = tpu.matmul %78, %80, %cst_85 {dimension_numbers = #tpu.dot_dimension_numbers<[1], [0], [0], [1], [0, 0, 1, 1], [], []>} : vector<128x4xbf16>, vector<4x4xbf16>, vector<128x4xf32> -> vector<128x4xf32>
    %c2_86 = arith.constant 2 : index
    %c2_87 = arith.constant 2 : index
    %c0_88 = arith.constant 0 : index
    %c0_89 = arith.constant 0 : index
    %82 = vector.load %arg4[%c2_86, %c2_87, %c0_88, %c0_89] : memref<3x3x4x4xbf16, #tpu.memory_space<vmem>>, vector<1x1x4x4xbf16>
    %83 = vector.shape_cast %82 : vector<1x1x4x4xbf16> to vector<4x4xbf16>
    %cst_90 = arith.constant dense<0.000000e+00> : vector<128x4xf32>
    %84 = tpu.matmul %78, %83, %cst_90 {dimension_numbers = #tpu.dot_dimension_numbers<[1], [0], [0], [1], [0, 0, 1, 1], [], []>} : vector<128x4xbf16>, vector<4x4xbf16>, vector<128x4xf32> -> vector<128x4xf32>
    %85 = arith.addf %76, %81 : vector<128x4xf32>
    %86 = arith.addf %77, %84 : vector<128x4xf32>
    %87 = vector.shape_cast %85 : vector<128x4xf32> to vector<8x16x4xf32>
    %c0_91 = arith.constant 0 : index
    %c0_92 = arith.constant 0 : index
    %c0_93 = arith.constant 0 : index
    %c0_94 = arith.constant 0 : index
    %c0_95 = arith.constant 0 : index
    %c0_96 = arith.constant 0 : index
    %88 = vector.load %arg5[%c0_91, %c0_92, %c0_93, %c0_94, %c0_95, %c0_96] : memref<1x1x8x2x16x4xf32, #tpu.memory_space<vmem>>, vector<1x1x8x1x16x4xf32>
    %89 = vector.shape_cast %88 : vector<1x1x8x1x16x4xf32> to vector<8x16x4xf32>
    %90 = vector.shape_cast %87 : vector<8x16x4xf32> to vector<1x1x8x1x16x4xf32>
    tpu.vector_store %arg5[%c0_91, %c0_92, %c0_93, %c0_94, %c0_95, %c0_96], %90 {strides = array<i32>} : memref<1x1x8x2x16x4xf32, #tpu.memory_space<vmem>>, vector<1x1x8x1x16x4xf32>,
    %91 = vector.shape_cast %86 : vector<128x4xf32> to vector<8x16x4xf32>
    %c0_97 = arith.constant 0 : index
    %c0_98 = arith.constant 0 : index
    %c0_99 = arith.constant 0 : index
    %c1_100 = arith.constant 1 : index
    %c0_101 = arith.constant 0 : index
    %c0_102 = arith.constant 0 : index
    %92 = vector.load %arg5[%c0_97, %c0_98, %c0_99, %c1_100, %c0_101, %c0_102] : memref<1x1x8x2x16x4xf32, #tpu.memory_space<vmem>>, vector<1x1x8x1x16x4xf32>
    %93 = vector.shape_cast %92 : vector<1x1x8x1x16x4xf32> to vector<8x16x4xf32>
    %94 = vector.shape_cast %91 : vector<8x16x4xf32> to vector<1x1x8x1x16x4xf32>
    tpu.vector_store %arg5[%c0_97, %c0_98, %c0_99, %c1_100, %c0_101, %c0_102], %94 {strides = array<i32>} : memref<1x1x8x2x16x4xf32, #tpu.memory_space<vmem>>, vector<1x1x8x1x16x4xf32>,
    return
  }
  func.func @transform_0(%arg0: i32, %arg1: i32) -> (i32, i32, i32, i32, i32) {
    %c0_i32 = arith.constant 0 : i32
    %c0_i32_0 = arith.constant 0 : i32
    %c0_i32_1 = arith.constant 0 : i32
    %c0_i32_2 = arith.constant 0 : i32
    return %arg0, %arg1, %c0_i32, %c0_i32_0, %c0_i32_1 : i32, i32, i32, i32, i32
  }
  func.func @transform_1(%arg0: i32, %arg1: i32) -> (i32, i32, i32, i32) {
    %c0_i32 = arith.constant 0 : i32
    %c0_i32_0 = arith.constant 0 : i32
    %c0_i32_1 = arith.constant 0 : i32
    %c0_i32_2 = arith.constant 0 : i32
    %c0_i32_3 = arith.constant 0 : i32
    return %c0_i32, %c0_i32_0, %c0_i32_1, %c0_i32_2 : i32, i32, i32, i32
  }
  func.func @transform_2(%arg0: i32, %arg1: i32) -> (i32, i32, i32, i32) {
    %c0_i32 = arith.constant 0 : i32
    %c0_i32_0 = arith.constant 0 : i32
    %c0_i32_1 = arith.constant 0 : i32
    %c0_i32_2 = arith.constant 0 : i32
    %c0_i32_3 = arith.constant 0 : i32
    return %c0_i32, %c0_i32_0, %c0_i32_1, %c0_i32_2 : i32, i32, i32, i32
  }
  func.func @transform_3(%arg0: i32, %arg1: i32) -> (i32, i32, i32, i32, i32, i32) {
    %c0_i32 = arith.constant 0 : i32
    %c0_i32_0 = arith.constant 0 : i32
    %c0_i32_1 = arith.constant 0 : i32
    %c0_i32_2 = arith.constant 0 : i32
    %c0_i32_3 = arith.constant 0 : i32
    return %arg0, %arg1, %c0_i32, %c0_i32_0, %c0_i32_1, %c0_i32_2 : i32, i32, i32, i32, i32, i32
  }
}

</mosaic_0001>

<bundles_post_ra>
// kernel: upsample.1
= control target key start
LH: loop header
LB: loop body
LE: loop exit
PB: predicated region body
PF: predicated region fallthrough
CT: control target
= control target key end

     0   :  { %s2439_s12 = smov 0   ;;  %s2441_s13 = smov 0   ;;  %s3602_s0 = inlined_call_operand.vmem [shape: bf16[2,2,10,18,4], index: 0, kind: input, shape index: {}]   ;;  %s3603_s1 = inlined_call_operand.vmem [shape: bf16[3,3,4,4], index: 1, kind: input, shape index: {}]   ;;  %s3604_s2 = inlined_call_operand.vmem [shape: bf16[3,3,4,4], index: 2, kind: input, shape index: {}]   ;;  %s3605_s3 = inlined_call_operand.vmem [shape: f32[2,2,8,2,16,4], index: 3, kind: output, shape index: {}]  }
   0x1   :  { %s2443_s14 = smov 0   ;;  %s2445_s15 = smov 0  }
   0x2   :  { %s2447_s16 = smov 0  }
   0x3 LB: > { %s22_s17 = sadd.s32 1, %s2409_s14  ;;  %s25_s18 = sadd.s32 1, %s2413_s15  ;;  %s2417_s16 = sphi %s2447_s16, %s13_s16   ;;  %s2413_s15 = sphi %s2445_s15, %s3671_s15   ;;  %s2409_s14 = sphi %s2443_s14, %s3670_s14   ;;  %s2405_s13 = sphi %s2441_s13, %s3669_s13   ;;  %s2401_s12 = sphi %s2439_s12, %s3668_s12  }
   0x4   : > { %p23_p0 = scmp.ge.s32.totalorder %s22_s17, 2  ;;  %p2092_p1 = scmp.ge.s32.totalorder %s2417_s16, 1 }
   0x5   : > { %p157_p2 = scmp.lt.s32.totalorder %s2417_s16, 5 }
   0x6   : > { %s3673_s17 = smov (%p23_p0, %s22_s17), 0  ;;  %s3675_s18 = smov (!%p23_p0, %s25_s18), %s2413_s15 }
   0x7   : > { %p158_p3 = pnand %p2092_p1, %p157_p2  ;;  %p27_p4 = scmp.ge.s32.totalorder %s3675_s18, 2 }
   0x9   : > { %s3677_s18 = smov (%p27_p4, %s3675_s18), 0  ;;  %161 = sbr.rel (%p158_p3) target bundleno = 746 (0x2ea), region = 32 }
   0xe   : > { %v2107_v0 = vld [vmem:[%s3603_s1 + $0x2] sm:$0x3]  ;;  %vm637_vm0 = vcmask 1041408   ;;  %p189_p5 = scmp.lt.s32.totalorder %s2405_s13, 1  ;;  %p191_p6 = scmp.lt.s32.totalorder %s2401_s12, 1  ;;  %vm612_vm3 = vcmask 31744  }
   0xf   : > { %v2116_v1 = vld [vmem:[%s3604_s2 + $0x2] sm:$0x3]  ;;  %v639_v2 = vsel %vm637_vm0, %v2107_v0, 0  ;;  %v584_v4 = vld [vmem:[%s3603_s1] sm:$0x3]  ;;  %v3630_v37 = vmov 0 }
  0x10   : > { %v693_v3 = vsel %vm637_vm0, %v2116_v1, 0  ;;  %648 = vmatpush.bf16.msra.mxu0 %v639_v2  ;;  %2335 = vmatpush.bf16.msra.mxu2 %v639_v2  ;;  %s3679_s13 = smov (!%p189_p5, %s2405_s13), 1  ;;  %s3681_s12 = smov (!%p191_p6, %s2401_s12), 1  ;;  %v793_v5 = vsel %vm637_vm0, %v584_v4, 0  ;;  %v585_v6 = vld [vmem:[%s3604_s2] sm:$0x3] }
  0x11   : > { %702 = vmatpush.bf16.msra.mxu1 %v693_v3  ;;  %2336 = vmatpush.bf16.msra.mxu3 %v693_v3  ;;  %v2173_v7 = vld [vmem:[%s3603_s1 + $0x4] sm:$0x3]  ;;  %s2338_s29 = smul.u32 60, %s3679_s13  ;;  %v845_v8 = vsel %vm637_vm0, %v585_v6, 0  ;;  %vm238_vm1 = vsmask.f32 3328 }
  0x12   : > { %v947_v9 = vsel %vm637_vm0, %v2173_v7, 0  ;;  %v2182_v10 = vld [vmem:[%s3604_s2 + $0x4] sm:$0x3]  ;;  %s2337_s5 = smul.u32 30, %s3681_s12  ;;  %vm239_vm2 = vsmask.f32 7440 }
  0x13   : > { %v1001_v11 = vsel %vm637_vm0, %v2182_v10, 0  ;;  %vm2540_vm4 = vmor %vm238_vm1, %vm239_vm2  ;;  %vm511_vm5 = vcmask 1042432   ;;  %vm512_vm6 = vcmask 1046532   ;;  %s2095_s23 = sshll.u32 %s3679_s13, 6 }
  0x14   : > { %802 = vmatpush.bf16.msrb.mxu2 %v793_v5  ;;  %956 = vmatpush.bf16.msrb.mxu0 %v947_v9  ;;  %s195_s6 = sadd.s32 %s2338_s29, %s2337_s5  ;;  %v3631_v37 = vsel %vm2540_vm4, 4294967295, %v3630_v37  ;;  %vm2670_vm7 = vmor %vm511_vm5, %vm512_vm6 }
  0x15   : > { %854 = vmatpush.bf16.msrb.mxu3 %v845_v8  ;;  %1010 = vmatpush.bf16.msrb.mxu1 %v1001_v11  ;;  %s2093_s7 = sshll.u32 %s195_s6, 2  ;;  %3632 = vst [vmem:[#allocation2_spill] sm:$0xff] %v3631_v37 }
  0x16   : > { %s2502_s10 = scalar_lea.vmem %s3602_s0, %s2093_s7 }
  0x17   : > { %v2505_v12 = vld [vmem:[%s2502_s10] sm:$0xf]  ;;  %v2508_v13 = vld [vmem:[%s2502_s10 + $0x4] sm:$0xf]  ;;  %v2511_v14 = vld [vmem:[%s2502_s10 + $0x8] sm:$0x1] }
  0x18   : > { %v242_v15 = vshrl.u32 %v2505_v12, 16  ;;  %v245_v16 = vshll.u32 %v2505_v12, 16  ;;  %v251_v17 = vshll.u32 %v2508_v13, 16  ;;  %v255_v18 = vshrl.u32 %v2508_v13, 16  ;;  %v2518_v19 = vld [vmem:[%s2502_s10 + $0x30] sm:$0xf] }
  0x19   : > { %v261_v20 = vshll.u32 %v2511_v14, 16  ;;  %v2522_v21 = vld [vmem:[%s2502_s10 + $0x34] sm:$0xf]  ;;  %v2525_v22 = vld [vmem:[%s2502_s10 + $0x38] sm:$0x1]  ;;  %v338_v29 = vshrl.u32 %v2518_v19, 16 }
  0x1a   : > { %v244_v23 = vrot.slane %v242_v15, 4  ;;  %v247_v24 = vrot.slane %v245_v16, 5  ;;  %v253_v25 = vrot.slane %v251_v17, 5  ;;  %v257_v26 = vrot.slane %v255_v18, 4  ;;  %v2528_v27 = vld [vmem:[%s2502_s10 + $0xc] sm:$0xf] }
  0x1b   : > { %v263_v28 = vrot.slane %v261_v20, 5  ;;  %v341_v30 = vshll.u32 %v2518_v19, 16  ;;  %v347_v31 = vshll.u32 %v2522_v21, 16  ;;  %v351_v34 = vshrl.u32 %v2522_v21, 16  ;;  %v2536_v36 = vld [vmem:[%s2502_s10 + $0x10] sm:$0xf] }
  0x1c   : > { %v248_v32 = vor.u32 %v247_v24, %v244_v23  ;;  %v258_v33 = vor.u32 %v257_v26, %v253_v25  ;;  %v357_v35 = vshll.u32 %v2525_v22, 16  ;;  %v340_v38 = vrot.slane %v338_v29, 4  ;;  %v2546_v47 = vld [vmem:[%s2502_s10 + $0x14] sm:$0x1]  ;;  %v2556_v55 = vld [vmem:[%s2502_s10 + $0x3c] sm:$0xf] }
  0x1d   : > { %v343_v39 = vrot.slane %v341_v30, 5  ;;  %v349_v40 = vrot.slane %v347_v31, 5  ;;  %v266_v41 = vshrl.u32 %v2528_v27, 16  ;;  %v353_v44 = vrot.slane %v351_v34, 4  ;;  %v2562_v3 = vld [vmem:[%s2502_s10 + $0x40] sm:$0xf] }
  0x1e   : > { %v249_v42 = vrot.slane %v248_v32, 4  ;;  %v259_v43 = vrot.slane %v258_v33, 4  ;;  %v359_v45 = vrot.slane %v357_v35, 5  ;;  %v269_v49 = vshll.u32 %v2528_v27, 16  ;;  %v2565_v4 = vld [vmem:[%s2502_s10 + $0x44] sm:$0x1] }
  0x1f   : > { %v344_v46 = vor.u32 %v343_v39, %v340_v38  ;;  %v268_v48 = vrot.slane %v266_v41, 4  ;;  %v275_v50 = vshll.u32 %v2536_v36, 16  ;;  %v354_v53 = vor.u32 %v353_v44, %v349_v40  ;;  %v2571_v10 = vld [vmem:[%s2502_s10 + $0x18] sm:$0xf]  ;;  %v2584_v29 = vld [vmem:[%s2502_s10 + $0x1c] sm:$0xf] }
  0x20   : > { %v254_v51 = vsel %vm2540_vm4, %v249_v42, %v253_v25  ;;  %v264_v52 = vsel %vm2540_vm4, %v259_v43, %v263_v28  ;;  %v279_v54 = vshrl.u32 %v2536_v36, 16  ;;  %v271_v59 = vrot.slane %v269_v49, 5  ;;  %v2590_v34 = vld [vmem:[%s2502_s10 + $0x48] sm:$0xf] }
  0x21   : > { %v588_v56 = vunpack.c.l.b16 %v254_v51  ;;  %v589_v57 = vunpack.c.l.b16 %v264_v52  ;;  %v345_v58 = vrot.slane %v344_v46, 4  ;;  %v355_v60 = vrot.slane %v354_v53, 4  ;;  %v2600_v46 = vld [vmem:[%s2502_s10 + $0x20] sm:$0x1] }
  0x22   : > { %v277_v61 = vrot.slane %v275_v50, 5  ;;  %v281_v62 = vrot.slane %v279_v54, 4  ;;  %v285_v63 = vshll.u32 %v2546_v47, 16  ;;  %v272_v2 = vor.u32 %v271_v59, %v268_v48  ;;  %v2604_v54 = vld [vmem:[%s2502_s10 + $0x4c] sm:$0xf] }
  0x23   : > { %v604_v0 = vpack.c.b16 %v589_v57, %v588_v56  ;;  %v350_v1 = vsel %vm2540_vm4, %v345_v58, %v349_v40  ;;  %v362_v5 = vshrl.u32 %v2556_v55, 16  ;;  %v360_v6 = vsel %vm2540_vm4, %v355_v60, %v359_v45 }
  0x24   : > { %v596_v7 = vunpack.c.l.b16 %v350_v1  ;;  %v282_v8 = vor.u32 %v281_v62, %v277_v61  ;;  %v287_v9 = vrot.slane %v285_v63, 5  ;;  %v597_v11 = vunpack.c.l.b16 %v360_v6 }
  0x25   : > { %2108 = vmatmul.msk.bf16.vlgmr.msra.gmra.mxu0 %vm612_vm3, %v604_v0  ;;  %2117 = vmatmul.msk.bf16.vlgmr.msra.gmra.mxu1 %vm612_vm3, %v604_v0  ;;  %v273_v15 = vrot.slane %v272_v2, 4  ;;  %v364_v16 = vrot.slane %v362_v5, 4  ;;  %v365_v17 = vshll.u32 %v2556_v55, 16  ;;  %v371_v20 = vshll.u32 %v2562_v3, 16 }
  0x26   : > { %v283_v18 = vrot.slane %v282_v8, 4  ;;  %v375_v23 = vshrl.u32 %v2562_v3, 16  ;;  %v381_v24 = vshll.u32 %v2565_v4, 16  ;;  %v2579_v25 = vpack.c.b16 %v597_v11, %v596_v7 }
  0x27   : > { %v278_v26 = vsel %vm2540_vm4, %v273_v15, %v277_v61  ;;  %v367_v28 = vrot.slane %v365_v17, 5  ;;  %v290_v30 = vshrl.u32 %v2571_v10, 16  ;;  %v373_v32 = vrot.slane %v371_v20, 5 }
  0x28   : > { %3633 = vst [vmem:[#allocation3_spill] sm:$0xff] %v2579_v25  ;;  %v288_v31 = vsel %vm2540_vm4, %v283_v18, %v287_v9  ;;  %v377_v33 = vrot.slane %v375_v23, 4  ;;  %2112 = vmatmul.msk.bf16.vlgmr.msra.gmra.mxu2 %vm612_vm3, %v2579_v25  ;;  %2121 = vmatmul.msk.bf16.vlgmr.msra.gmra.mxu3 %vm612_vm3, %v2579_v25  ;;  %v590_v35 = vunpack.c.l.b16 %v278_v26  ;;  %v383_v39 = vrot.slane %v381_v24, 5  ;;  %v2617_v9 = vld [vmem:[%s2502_s10 + $0x50] sm:$0x1] }
  0x29   : > { %v368_v38 = vor.u32 %v367_v28, %v364_v16  ;;  %v293_v41 = vshll.u32 %v2571_v10, 16  ;;  %v299_v42 = vshll.u32 %v2584_v29, 16  ;;  %v303_v43 = vshrl.u32 %v2584_v29, 16  ;;  %v2620_v18 = vld [vmem:[%s2502_s10 + $0x24] sm:$0xf] }
  0x2a   : > { %v378_v40 = vor.u32 %v377_v33, %v373_v32  ;;  %v591_v44 = vunpack.c.l.b16 %v288_v31  ;;  %v292_v48 = vrot.slane %v290_v30, 4  ;;  %v386_v49 = vshrl.u32 %v2590_v34, 16  ;;  %v2630_v26 = vld [vmem:[%s2502_s10 + $0x28] sm:$0xf] }
  0x2b   : > { %v369_v45 = vrot.slane %v368_v38, 4  ;;  %v295_v51 = vrot.slane %v293_v41, 5  ;;  %v301_v52 = vrot.slane %v299_v42, 5  ;;  %v305_v53 = vrot.slane %v303_v43, 4  ;;  %v2645_v41 = vld [vmem:[%s2502_s10 + $0x54] sm:$0xf] }
  0x2c   : > { %v379_v50 = vrot.slane %v378_v40, 4  ;;  %v389_v56 = vshll.u32 %v2590_v34, 16  ;;  %v2611_v59 = vpack.c.b16 %v591_v44, %v590_v35  ;;  %v309_v60 = vshll.u32 %v2600_v46, 16  ;;  %v2648_v42 = vld [vmem:[%s2502_s10 + $0x58] sm:$0xf] }
  0x2d   : > { %v374_v57 = vsel %vm2540_vm4, %v369_v45, %v373_v32  ;;  %v395_v61 = vshll.u32 %v2604_v54, 16  ;;  %v399_v62 = vshrl.u32 %v2604_v54, 16  ;;  %v296_v63 = vor.u32 %v295_v51, %v292_v48 }
  0x2e   : > { %v384_v58 = vsel %vm2540_vm4, %v379_v50, %v383_v39  ;;  %v306_v0 = vor.u32 %v305_v53, %v301_v52  ;;  %v388_v1 = vrot.slane %v386_v49, 4  ;;  %v391_v2 = vrot.slane %v389_v56, 5  ;;  %v2653_v49 = vld [vmem:[%s2502_s10 + $0x2c] sm:$0x1] }
  0x2f   : > { %v598_v5 = vunpack.c.l.b16 %v374_v57  ;;  %v599_v6 = vunpack.c.l.b16 %v384_v58  ;;  %v397_v7 = vrot.slane %v395_v61, 5  ;;  %v401_v8 = vrot.slane %v399_v62, 4 }
  0x30   : > { %v297_v11 = vrot.slane %v296_v63, 4  ;;  %v307_v15 = vrot.slane %v306_v0, 4  ;;  %v311_v16 = vrot.slane %v309_v60, 5  ;;  %v392_v17 = vor.u32 %v391_v2, %v388_v1 }
  0x31   : > { %v2624_v20 = vpack.c.b16 %v599_v6, %v598_v5  ;;  %v402_v23 = vor.u32 %v401_v8, %v397_v7  ;;  %v405_v24 = vshll.u32 %v2617_v9, 16  ;;  %v314_v28 = vshrl.u32 %v2620_v18, 16 }
  0x32   : > { %v302_v30 = vsel %vm2540_vm4, %v297_v11, %v301_v52  ;;  %v312_v31 = vsel %vm2540_vm4, %v307_v15, %v311_v16  ;;  %v393_v32 = vrot.slane %v392_v17, 4  ;;  %v317_v33 = vshll.u32 %v2620_v18, 16  ;;  %v2667_v11 = vld [vmem:[%s2502_s10 + $0x5c] sm:$0x1] }
  0x33   : > { %3634 = vst [vmem:[#allocation4_spill] sm:$0xff] %v2624_v20  ;;  %v403_v35 = vrot.slane %v402_v23, 4  ;;  %v407_v38 = vrot.slane %v405_v24, 5  ;;  %v323_v39 = vshll.u32 %v2630_v26, 16  ;;  %v327_v40 = vshrl.u32 %v2630_v26, 16 }
  0x34   : > { %v592_v43 = vunpack.c.l.b16 %v302_v30  ;;  %v593_v44 = vunpack.c.l.b16 %v312_v31  ;;  %v316_v45 = vrot.slane %v314_v28, 4  ;;  %v398_v48 = vsel %vm2540_vm4, %v393_v32, %v397_v7 }
  0x35   : > { %2109 = vmatmul.msk.bf16.gmra.mxu0 %vm612_vm3, %v2611_v59  ;;  %2118 = vmatmul.msk.bf16.gmra.mxu1 %vm612_vm3, %v2611_v59  ;;  %v319_v50 = vrot.slane %v317_v33, 5  ;;  %v410_v51 = vshrl.u32 %v2645_v41, 16  ;;  %v413_v52 = vshll.u32 %v2645_v41, 16  ;;  %v408_v53 = vsel %vm2540_vm4, %v403_v35, %v407_v38 }
  0x36   : > { %v325_v56 = vrot.slane %v323_v39, 5  ;;  %v329_v57 = vrot.slane %v327_v40, 4  ;;  %v419_v58 = vshll.u32 %v2648_v42, 16  ;;  %v423_v60 = vshrl.u32 %v2648_v42, 16 }
  0x37   : > { %v519_v61 = vrot.slane %v2511_v14, 5  ;;  %v600_v62 = vunpack.c.l.b16 %v398_v48  ;;  %v333_v63 = vshll.u32 %v2653_v49, 16  ;;  %v601_v0 = vunpack.c.l.b16 %v408_v53 }
  0x38   : > { %2113 = vmatmul.msk.bf16.gmra.mxu2 %vm612_vm3, %v2624_v20  ;;  %2122 = vmatmul.msk.bf16.gmra.mxu3 %vm612_vm3, %v2624_v20  ;;  %v412_v1 = vrot.slane %v410_v51, 4  ;;  %v415_v2 = vrot.slane %v413_v52, 5  ;;  %v516_v5 = vrot.slane %v2508_v13, 5  ;;  %v2664_v6 = vpack.c.b16 %v593_v44, %v592_v43  ;;  %v2204_v51 = vld [vmem:[%s3604_s2 + $0x6] sm:$0x3] }
  0x39   : > { %v320_v7 = vor.u32 %v319_v50, %v316_v45  ;;  %v330_v8 = vor.u32 %v329_v57, %v325_v56  ;;  %v421_v15 = vrot.slane %v419_v58, 5  ;;  %v425_v16 = vrot.slane %v423_v60, 4  ;;  %v2191_v50 = vld [vmem:[%s3603_s1 + $0x6] sm:$0x3]  ;;  %v2213_v52 = vld [vmem:[%s3603_s1 + $0x8] sm:$0x3] }
  0x3a   : > { %3635 = vst [vmem:[#allocation5_spill] sm:$0xff] %v2664_v6  ;;  %v2097_v14 = vrot.slane %v2505_v12, 9  ;;  %v335_v17 = vrot.slane %v333_v63, 5  ;;  %v3636_v23 = vmov 0  ;;  %v518_v24 = vrot.slane %v516_v5, 4 }
  0x3b   : > { %v3637_v23 = vsel %vm2670_vm7, 4294967295, %v3636_v23  ;;  %v2674_v28 = vpack.c.b16 %v601_v0, %v600_v62  ;;  %v416_v13 = vor.u32 %v415_v2, %v412_v1  ;;  %v429_v30 = vshll.u32 %v2667_v11, 16  ;;  %v2222_v60 = vld [vmem:[%s3604_s2 + $0x8] sm:$0x3] }
  0x3c   : > { %3638 = vst [vmem:[#allocation6_spill] sm:$0xff] %v3637_v23  ;;  %v517_v31 = vsel %vm2670_vm7, %v2097_v14, %v516_v5  ;;  %v321_v12 = vrot.slane %v320_v7, 4  ;;  %v331_v32 = vrot.slane %v330_v8, 4  ;;  %v520_v33 = vsel %vm2670_vm7, %v518_v24, %v519_v61 }
  0x3d   : > { %3639 = vst [vmem:[#allocation7_spill] sm:$0xff] %v2674_v28  ;;  %v898_v35 = vunpack.c.l.b16 %v517_v31  ;;  %v426_v38 = vor.u32 %v425_v16, %v421_v15  ;;  %v899_v39 = vunpack.c.l.b16 %v520_v33  ;;  %v417_v40 = vrot.slane %v416_v13, 4 }
  0x3e   : > { %v431_v43 = vrot.slane %v429_v30, 5  ;;  %v326_v45 = vsel %vm2540_vm4, %v321_v12, %v325_v56  ;;  %v336_v48 = vsel %vm2540_vm4, %v331_v32, %v335_v17  ;;  %v1093_v57 = vsel %vm637_vm0, %v2191_v50, 0  ;;  %v2756_v50 = vld [vmem:[%s2502_s10 + $0xc] sm:$0xff] }
  0x3f   : > { %v914_v44 = vpack.c.b16 %v899_v39, %v898_v35  ;;  %v427_v53 = vrot.slane %v426_v38, 4  ;;  %v1147_v56 = vsel %vm637_vm0, %v2204_v51, 0  ;;  %v1239_v58 = vsel %vm637_vm0, %v2213_v52, 0  ;;  %1102 = vmatpush.bf16.msra.mxu2 %v1093_v57  ;;  %v2325_v38 = vld [vmem:[%s2502_s10] sm:$0xff] }
  0x40   : > { %1156 = vmatpush.bf16.msra.mxu3 %v1147_v56  ;;  %v1293_v61 = vsel %vm637_vm0, %v2222_v60, 0  ;;  %1248 = vmatpush.bf16.msra.mxu0 %v1239_v58  ;;  %v594_v62 = vunpack.c.l.b16 %v326_v45  ;;  %v595_v63 = vunpack.c.l.b16 %v336_v48  ;;  %v422_v0 = vsel %vm2540_vm4, %v417_v40, %v421_v15 }
  0x41   : > { %1302 = vmatpush.bf16.msra.mxu1 %v1293_v61  ;;  %v432_v1 = vsel %vm2540_vm4, %v427_v53, %v431_v43  ;;  %v523_v2 = vrot.slane %v2536_v36, 5  ;;  %v602_v7 = vunpack.c.l.b16 %v422_v0  ;;  %v2098_v16 = vrot.slane %v2528_v27, 9  ;;  %v2781_v53 = vld [vmem:[%s2502_s10 + $0x24] sm:$0xff] }
  0x42   : > { %v2714_v5 = vpack.c.b16 %v595_v63, %v594_v62  ;;  %v603_v8 = vunpack.c.l.b16 %v432_v1  ;;  %v526_v17 = vrot.slane %v2546_v47, 5  ;;  %v530_v47 = vrot.slane %v2584_v29, 5  ;;  %v2805_v1 = vld [vmem:[%s2502_s10 + $0x30] sm:$0xff] }
  0x43   : > { %v525_v14 = vrot.slane %v523_v2, 4  ;;  %v524_v24 = vsel %vm2670_vm7, %v2098_v16, %v523_v2  ;;  %v2099_v31 = vrot.slane %v2571_v10, 9  ;;  %v533_v32 = vrot.slane %v2600_v46, 5 }
  0x44   : > { %3640 = vst [vmem:[#allocation8_spill] sm:$0xff] %v2714_v5  ;;  %v2724_v36 = vpack.c.b16 %v603_v8, %v602_v7  ;;  %v900_v13 = vunpack.c.l.b16 %v524_v24  ;;  %v532_v12 = vrot.slane %v530_v47, 4  ;;  %v537_v10 = vrot.slane %v2630_v26, 5 }
  0x45   : > { %2110 = vmatmul.msk.bf16.gmra.mxu0 %vm612_vm3, %v2664_v6  ;;  %2119 = vmatmul.msk.bf16.gmra.mxu1 %vm612_vm3, %v2664_v6  ;;  %v527_v15 = vsel %vm2670_vm7, %v525_v14, %v526_v17  ;;  %v531_v33 = vsel %vm2670_vm7, %v2099_v31, %v530_v47  ;;  %v2100_v46 = vrot.slane %v2620_v18, 9  ;;  %v540_v45 = vrot.slane %v2653_v49, 5  ;;  %v2769_v49 = vld [vmem:[%s2502_s10 + $0x18] sm:$0xff] }
  0x46   : > { %v901_v27 = vunpack.c.l.b16 %v527_v15  ;;  %v534_v35 = vsel %vm2670_vm7, %v532_v12, %v533_v32  ;;  %v902_v39 = vunpack.c.l.b16 %v531_v33  ;;  %v539_v43 = vrot.slane %v537_v10, 4  ;;  %v2841_v33 = vld [vmem:[%s2502_s10 + $0x3c] sm:$0xff] }
  0x47   : > { %v903_v40 = vunpack.c.l.b16 %v534_v35  ;;  %v538_v48 = vsel %vm2670_vm7, %v2100_v46, %v537_v10  ;;  %v544_v52 = vrot.slane %v2522_v21, 5  ;;  %v2101_v57 = vrot.slane %v2518_v19, 9 }
  0x48   : > { %2114 = vmatmul.msk.bf16.gmra.mxu2 %vm612_vm3, %v2674_v28  ;;  %2123 = vmatmul.msk.bf16.gmra.mxu3 %vm612_vm3, %v2674_v28  ;;  %v2728_v30 = vpack.c.b16 %v901_v27, %v900_v13  ;;  %v904_v26 = vunpack.c.l.b16 %v538_v48  ;;  %v547_v58 = vrot.slane %v2525_v22, 5  ;;  %v551_v22 = vrot.slane %v2562_v3, 5 }
  0x49   : > { %v2744_v29 = vpack.c.b16 %v903_v40, %v902_v39  ;;  %v546_v56 = vrot.slane %v544_v52, 4  ;;  %v545_v21 = vsel %vm2670_vm7, %v2101_v57, %v544_v52  ;;  %v2102_v2 = vrot.slane %v2556_v55, 9 }
  0x4a   : > { %v906_v61 = vunpack.c.l.b16 %v545_v21  ;;  %v553_v7 = vrot.slane %v551_v22, 4  ;;  %v554_v8 = vrot.slane %v2565_v4, 5  ;;  %v558_v31 = vrot.slane %v2604_v54, 5 }
  0x4b   : > { %v548_v60 = vsel %vm2670_vm7, %v546_v56, %v547_v58  ;;  %v552_v14 = vsel %vm2670_vm7, %v2102_v2, %v551_v22  ;;  %v2103_v35 = vrot.slane %v2590_v34, 9  ;;  %v561_v39 = vrot.slane %v2617_v9, 5  ;;  %v2877_v56 = vld [vmem:[%s2502_s10 + $0x48] sm:$0xff] }
  0x4c   : > { %v907_v62 = vunpack.c.l.b16 %v548_v60  ;;  %v555_v55 = vsel %vm2670_vm7, %v553_v7, %v554_v8  ;;  %v908_v24 = vunpack.c.l.b16 %v552_v14  ;;  %v2104_v58 = vrot.slane %v2645_v41, 9 }
  0x4d   : > { %v909_v15 = vunpack.c.l.b16 %v555_v55  ;;  %v559_v10 = vsel %vm2670_vm7, %v2103_v35, %v558_v31  ;;  %v568_v60 = vrot.slane %v2667_v11, 5 }
  0x4e   : > { %v2797_v63 = vpack.c.b16 %v907_v62, %v906_v61  ;;  %v2240_v61 = vld [vmem:[%s3604_s2 + $0xa] sm:$0x3] }
  0x4f   : > { %v2829_v13 = vpack.c.b16 %v909_v15, %v908_v24  ;;  %v1439_v7 = vsel %vm637_vm0, %v2240_v61, 0  ;;  %v2249_v15 = vld [vmem:[%s3603_s1 + $0xc] sm:$0x3] }
  0x50   : > { %3641 = vst [vmem:[#allocation9_spill] sm:$0xff] %v2797_v63  ;;  %v1531_v35 = vsel %vm637_vm0, %v2249_v15, 0 }
  0x51   : > { %3642 = vst [vmem:[#allocation10_spill] sm:$0xff] %v2829_v13 }
  0x55   : > { %2111 = vmatmul.msk.bf16.gmra.mxu0 %vm612_vm3, %v2714_v5  ;;  %2120 = vmatmul.msk.bf16.gmra.mxu1 %vm612_vm3, %v2714_v5 }
  0x58   : > { %2115 = vmatmul.msk.bf16.gmra.mxu2 %vm612_vm3, %v2724_v36  ;;  %2124 = vmatmul.msk.bf16.gmra.mxu3 %vm612_vm3, %v2724_v36 }
  0x65   : > { %2174 = vmatmul.msk.bf16.vlgmr.msrb.gmra.mxu0 %vm612_vm3, %v914_v44  ;;  %2183 = vmatmul.msk.bf16.vlgmr.msrb.gmra.mxu1 %vm612_vm3, %v914_v44  ;;  %v541_v44 = vsel %vm2670_vm7, %v539_v43, %v540_v45  ;;  %v910_v43 = vunpack.c.l.b16 %v559_v10 }
  0x66   : > { %v905_v18 = vunpack.c.l.b16 %v541_v44  ;;  %1540 = vmatpush.bf16.msrb.mxu0 %v1531_v35 }
  0x68   : > { %2157 = vmatmul.msk.bf16.vlgmr.msrb.gmra.mxu2 %vm612_vm3, %v2325_v38  ;;  %2165 = vmatmul.msk.bf16.vlgmr.msrb.gmra.mxu3 %vm612_vm3, %v2325_v38  ;;  %v2762_v51 = vpack.c.b16 %v905_v18, %v904_v26  ;;  %v560_v38 = vrot.slane %v558_v31, 4  ;;  %v565_v18 = vrot.slane %v2648_v42, 5  ;;  %v2231_v42 = vld [vmem:[%s3603_s1 + $0xa] sm:$0x3]  ;;  %v2262_v31 = vld [vmem:[%s3604_s2 + $0xc] sm:$0x3] }
  0x69   : > { %v1385_v2 = vsel %vm637_vm0, %v2231_v42, 0  ;;  %1448 = vmatpush.bf16.msrb.mxu3 %v1439_v7 }
  0x6a   : > { %v562_v34 = vsel %vm2670_vm7, %v560_v38, %v561_v39  ;;  %v567_v21 = vrot.slane %v565_v18, 4  ;;  %v566_v11 = vsel %vm2670_vm7, %v2104_v58, %v565_v18  ;;  %1394 = vmatpush.bf16.msrb.mxu2 %v1385_v2  ;;  %v1585_v38 = vsel %vm637_vm0, %v2262_v31, 0  ;;  %v2928_v18 = vld [vmem:[%s2502_s10 + $0x54] sm:$0xff] }
  0x6b   : > { %v911_v45 = vunpack.c.l.b16 %v562_v34  ;;  %v912_v55 = vunpack.c.l.b16 %v566_v11  ;;  %1594 = vmatpush.bf16.msrb.mxu1 %v1585_v38 }
  0x6c   : > { %v569_v22 = vsel %vm2670_vm7, %v567_v21, %v568_v60 }
  0x6d   : > { %v2865_v48 = vpack.c.b16 %v911_v45, %v910_v43  ;;  %v913_v24 = vunpack.c.l.b16 %v569_v22 }
  0x6f   : > { %3643 = vst [vmem:[#allocation11_spill] sm:$0xff] %v2865_v48  ;;  %v2917_v39 = vpack.c.b16 %v913_v24, %v912_v55 }
  0x71   : > { %3644 = vst [vmem:[#allocation12_spill] sm:$0xff] %v2917_v39 }
  0x75   : > { %2175 = vmatmul.msk.bf16.gmra.mxu0 %vm612_vm3, %v2728_v30  ;;  %2184 = vmatmul.msk.bf16.gmra.mxu1 %vm612_vm3, %v2728_v30 }
  0x78   : > { %2158 = vmatmul.msk.bf16.gmra.mxu2 %vm612_vm3, %v2756_v50  ;;  %2166 = vmatmul.msk.bf16.gmra.mxu3 %vm612_vm3, %v2756_v50 }
  0x85   : > { %2176 = vmatmul.msk.bf16.gmra.mxu0 %vm612_vm3, %v2744_v29  ;;  %2185 = vmatmul.msk.bf16.gmra.mxu1 %vm612_vm3, %v2744_v29 }
  0x88   : > { %2159 = vmatmul.msk.bf16.gmra.mxu2 %vm612_vm3, %v2769_v49  ;;  %2167 = vmatmul.msk.bf16.gmra.mxu3 %vm612_vm3, %v2769_v49 }
  0x95   : > { %2177 = vmatmul.msk.bf16.gmra.mxu0 %vm612_vm3, %v2762_v51  ;;  %2186 = vmatmul.msk.bf16.gmra.mxu1 %vm612_vm3, %v2762_v51 }
  0x98   : > { %2160 = vmatmul.msk.bf16.gmra.mxu2 %vm612_vm3, %v2781_v53  ;;  %2168 = vmatmul.msk.bf16.gmra.mxu3 %vm612_vm3, %v2781_v53 }
  0xa2   : > { %v2799_v19 = vpop.f32.mrf.mxu0  ;;  %v2801_v0 = vpop.f32.mrf.mxu1 }
  0xa5   : > { %2178 = vmatmul.msk.bf16.gmra.mxu0 %vm612_vm3, %v2797_v63  ;;  %2187 = vmatmul.msk.bf16.gmra.mxu1 %vm612_vm3, %v2797_v63 }
  0xa8   : > { %2161 = vmatmul.msk.bf16.gmra.mxu2 %vm612_vm3, %v2805_v1  ;;  %2169 = vmatmul.msk.bf16.gmra.mxu3 %vm612_vm3, %v2805_v1 }
  0xaa   : > { %v2817_v3 = vpop.f32.mrf.mxu0  ;;  %v2819_v16 = vpop.f32.mrf.mxu1 }
  0xab   : > { %v2825_v17 = vpop.f32.mrf.mxu2  ;;  %v2827_v4 = vpop.f32.mrf.mxu3 }
  0xb2   : > { %v2831_v27 = vpop.f32.mrf.mxu0  ;;  %v2833_v47 = vpop.f32.mrf.mxu1 }
  0xb3   : > { %v2836_v12 = vpop.f32.mrf.mxu2  ;;  %v2838_v32 = vpop.f32.mrf.mxu3 }
  0xb5   : > { %2179 = vmatmul.msk.bf16.gmra.mxu0 %vm612_vm3, %v2829_v13  ;;  %2188 = vmatmul.msk.bf16.gmra.mxu1 %vm612_vm3, %v2829_v13 }
  0xb8   : > { %2162 = vmatmul.msk.bf16.gmra.mxu2 %vm612_vm3, %v2841_v33  ;;  %2170 = vmatmul.msk.bf16.gmra.mxu3 %vm612_vm3, %v2841_v33 }
  0xba   : > { %v2853_v54 = vpop.f32.mrf.mxu0  ;;  %v2855_v40 = vpop.f32.mrf.mxu1 }
  0xbb   : > { %v2861_v46 = vpop.f32.mrf.mxu2  ;;  %v2863_v9 = vpop.f32.mrf.mxu3 }
  0xc2   : > { %v2867_v44 = vpop.f32.mrf.mxu0  ;;  %v2869_v26 = vpop.f32.mrf.mxu1 }
  0xc3   : > { %v2872_v52 = vpop.f32.mrf.mxu2  ;;  %v2874_v57 = vpop.f32.mrf.mxu3 }
  0xc5   : > { %2180 = vmatmul.msk.bf16.gmra.mxu0 %vm612_vm3, %v2865_v48  ;;  %2189 = vmatmul.msk.bf16.gmra.mxu1 %vm612_vm3, %v2865_v48 }
  0xc8   : > { %2163 = vmatmul.msk.bf16.gmra.mxu2 %vm612_vm3, %v2877_v56  ;;  %2171 = vmatmul.msk.bf16.gmra.mxu3 %vm612_vm3, %v2877_v56 }
  0xca   : > { %v2895_v62 = vpop.f32.mrf.mxu0  ;;  %v2897_v41 = vpop.f32.mrf.mxu1 }
  0xcb   : > { %v2905_v8 = vpop.f32.mrf.mxu2  ;;  %v2907_v14 = vpop.f32.mrf.mxu3 }
  0xd2   : > { %v2919_v10 = vpop.f32.mrf.mxu0  ;;  %v2921_v34 = vpop.f32.mrf.mxu1 }
  0xd3   : > { %v2923_v43 = vpop.f32.mrf.mxu2  ;;  %v2925_v45 = vpop.f32.mrf.mxu3 }
  0xd5   : > { %2181 = vmatmul.msk.bf16.gmra.mxu0 %vm612_vm3, %v2917_v39  ;;  %2190 = vmatmul.msk.bf16.gmra.mxu1 %vm612_vm3, %v2917_v39 }
  0xd8   : > { %2164 = vmatmul.msk.bf16.gmra.mxu2 %vm612_vm3, %v2928_v18  ;;  %2172 = vmatmul.msk.bf16.gmra.mxu3 %vm612_vm3, %v2928_v18 }
  0xda   : > { %v2938_v58 = vpop.f32.mrf.mxu0  ;;  %v2940_v21 = vpop.f32.mrf.mxu1 }
  0xdb   : > { %v2942_v60 = vpop.f32.mrf.mxu2  ;;  %v2944_v42 = vpop.f32.mrf.mxu3 }
  0xe2   : > { %v958_v61 = vpop.f32.mrf.mxu0  ;;  %v1012_v11 = vpop.f32.mrf.mxu1 }
  0xe3   : > { %v2946_v22 = vpop.f32.mrf.mxu2  ;;  %v2948_v2 = vpop.f32.mrf.mxu3 }
  0xe5   : > { %2214 = vmatmul.msk.bf16.vlgmr.msra.gmra.mxu0 %vm612_vm3, %v2611_v59  ;;  %2223 = vmatmul.msk.bf16.vlgmr.msra.gmra.mxu1 %vm612_vm3, %v2611_v59 }
  0xe8   : > { %2196 = vmatmul.msk.bf16.vlgmr.msra.gmra.mxu2 %vm612_vm3, %v2756_v50  ;;  %2205 = vmatmul.msk.bf16.vlgmr.msra.gmra.mxu3 %vm612_vm3, %v2756_v50 }
  0xea   : > { %v960_v7 = vpop.f32.mrf.mxu0  ;;  %v1014_v55 = vpop.f32.mrf.mxu1 }
  0xeb   : > { %v804_v24 = vpop.f32.mrf.mxu2  ;;  %v856_v15 = vpop.f32.mrf.mxu3 }
  0xec   : > { %v805_v31 = vadd.f32 %v804_v24, %v2799_v19  ;;  %v857_v35 = vadd.f32 %v856_v15, %v2801_v0 }
  0xee   : > { %v2960_v38 = vadd.f32 %v958_v61, %v805_v31  ;;  %v2962_v23 = vadd.f32 %v1012_v11, %v857_v35 }
  0xf2   : > { %v963_v39 = vpop.f32.mrf.mxu0  ;;  %v1017_v59 = vpop.f32.mrf.mxu1 }
  0xf3   : > { %v806_v48 = vpop.f32.mrf.mxu2  ;;  %v858_v13 = vpop.f32.mrf.mxu3 }
  0xf4   : > { %v807_v63 = vadd.f32 %v806_v48, %v2817_v3  ;;  %v859_v50 = vadd.f32 %v858_v13, %v2819_v16 }
  0xf5   : > { %2215 = vmatmul.msk.bf16.gmra.mxu0 %vm612_vm3, %v2664_v6  ;;  %2224 = vmatmul.msk.bf16.gmra.mxu1 %vm612_vm3, %v2664_v6 }
  0xf6   : > { %v2970_v19 = vadd.f32 %v960_v7, %v807_v63  ;;  %v2972_v0 = vadd.f32 %v1014_v55, %v859_v50 }
  0xf8   : > { %2197 = vmatmul.msk.bf16.gmra.mxu2 %vm612_vm3, %v2769_v49  ;;  %2206 = vmatmul.msk.bf16.gmra.mxu3 %vm612_vm3, %v2769_v49 }
  0xfa   : > { %v965_v61 = vpop.f32.mrf.mxu0  ;;  %v1019_v3 = vpop.f32.mrf.mxu1 }
  0xfb   : > { %v809_v48 = vpop.f32.mrf.mxu2  ;;  %v861_v16 = vpop.f32.mrf.mxu3 }
  0xfc   : > { %v810_v13 = vadd.f32 %v809_v48, %v2831_v27  ;;  %v862_v11 = vadd.f32 %v861_v16, %v2833_v47 }
  0xfe   : > { %v2980_v24 = vadd.f32 %v963_v39, %v810_v13  ;;  %v2982_v63 = vadd.f32 %v1017_v59, %v862_v11 }
 0x102   : > { %v968_v7 = vpop.f32.mrf.mxu0  ;;  %v1022_v55 = vpop.f32.mrf.mxu1 }
 0x103   : > { %v811_v15 = vpop.f32.mrf.mxu2  ;;  %v863_v31 = vpop.f32.mrf.mxu3 }
 0x104   : > { %v812_v35 = vadd.f32 %v811_v15, %v2853_v54  ;;  %v864_v50 = vadd.f32 %v863_v31, %v2855_v40 }
 0x105   : > { %2216 = vmatmul.msk.bf16.gmra.mxu0 %vm612_vm3, %v2714_v5  ;;  %2225 = vmatmul.msk.bf16.gmra.mxu1 %vm612_vm3, %v2714_v5 }
 0x106   : > { %v2990_v27 = vadd.f32 %v965_v61, %v812_v35  ;;  %v2992_v47 = vadd.f32 %v1019_v3, %v864_v50 }
 0x108   : > { %2198 = vmatmul.msk.bf16.gmra.mxu2 %vm612_vm3, %v2781_v53  ;;  %2207 = vmatmul.msk.bf16.gmra.mxu3 %vm612_vm3, %v2781_v53 }
 0x10a   : > { %v970_v39 = vpop.f32.mrf.mxu0  ;;  %v1024_v54 = vpop.f32.mrf.mxu1 }
 0x10b   : > { %v814_v59 = vpop.f32.mrf.mxu2  ;;  %v866_v40 = vpop.f32.mrf.mxu3 }
 0x10c   : > { %v815_v48 = vadd.f32 %v814_v59, %v2867_v44  ;;  %v867_v16 = vadd.f32 %v866_v40, %v2869_v26 }
 0x10e   : > { %v3000_v13 = vadd.f32 %v968_v7, %v815_v48  ;;  %v3002_v61 = vadd.f32 %v1022_v55, %v867_v16 }
 0x112   : > { %v973_v3 = vpop.f32.mrf.mxu0  ;;  %v1027_v11 = vpop.f32.mrf.mxu1 }
 0x113   : > { %v816_v15 = vpop.f32.mrf.mxu2  ;;  %v868_v31 = vpop.f32.mrf.mxu3 }
 0x114   : > { %v817_v35 = vadd.f32 %v816_v15, %v2895_v62  ;;  %v869_v50 = vadd.f32 %v868_v31, %v2897_v41 }
 0x115   : > { %2217 = vmatmul.msk.bf16.gmra.mxu0 %vm612_vm3, %v2579_v25  ;;  %2226 = vmatmul.msk.bf16.gmra.mxu1 %vm612_vm3, %v2579_v25  ;;  %v3071_v25 = vld [vmem:[%s2502_s10 + $0x68] sm:$0x1] }
 0x116   : > { %v3010_v44 = vadd.f32 %v970_v39, %v817_v35  ;;  %v3012_v26 = vadd.f32 %v1024_v54, %v869_v50 }
 0x118   : > { %2199 = vmatmul.msk.bf16.gmra.mxu2 %vm612_vm3, %v2805_v1  ;;  %2208 = vmatmul.msk.bf16.gmra.mxu3 %vm612_vm3, %v2805_v1 }
 0x11a   : > { %v975_v7 = vpop.f32.mrf.mxu0  ;;  %v1029_v62 = vpop.f32.mrf.mxu1 }
 0x11b   : > { %v819_v55 = vpop.f32.mrf.mxu2  ;;  %v871_v41 = vpop.f32.mrf.mxu3 }
 0x11c   : > { %v820_v59 = vadd.f32 %v819_v55, %v2919_v10  ;;  %v872_v40 = vadd.f32 %v871_v41, %v2921_v34 }
 0x11e   : > { %v3020_v48 = vadd.f32 %v973_v3, %v820_v59  ;;  %v3022_v39 = vadd.f32 %v1027_v11, %v872_v40 }
 0x122   : > { %v978_v54 = vpop.f32.mrf.mxu0  ;;  %v1032_v16 = vpop.f32.mrf.mxu1 }
 0x123   : > { %v821_v15 = vpop.f32.mrf.mxu2  ;;  %v873_v31 = vpop.f32.mrf.mxu3 }
 0x124   : > { %v822_v35 = vadd.f32 %v821_v15, %v2938_v58  ;;  %v874_v50 = vadd.f32 %v873_v31, %v2940_v21 }
 0x125   : > { %2218 = vmatmul.msk.bf16.gmra.mxu0 %vm612_vm3, %v2624_v20  ;;  %2227 = vmatmul.msk.bf16.gmra.mxu1 %vm612_vm3, %v2624_v20 }
 0x126   : > { %v3030_v10 = vadd.f32 %v975_v7, %v822_v35  ;;  %v3032_v34 = vadd.f32 %v1029_v62, %v874_v50 }
 0x128   : > { %2200 = vmatmul.msk.bf16.gmra.mxu2 %vm612_vm3, %v2841_v33  ;;  %2209 = vmatmul.msk.bf16.gmra.mxu3 %vm612_vm3, %v2841_v33 }
 0x12a   : > { %v980_v3 = vpop.f32.mrf.mxu0  ;;  %v1034_v58 = vpop.f32.mrf.mxu1 }
 0x12b   : > { %v824_v21 = vpop.f32.mrf.mxu2  ;;  %v876_v11 = vpop.f32.mrf.mxu3 }
 0x12c   : > { %v825_v55 = vadd.f32 %v824_v21, %v2825_v17  ;;  %v877_v41 = vadd.f32 %v876_v11, %v2827_v4  ;;  %v3051_v17 = vld [vmem:[%s2502_s10 + $0x60] sm:$0xf]  ;;  %v3054_v4 = vld [vmem:[%s2502_s10 + $0x64] sm:$0xf] }
 0x12d   : > { %3647 = vst [vmem:[#allocation15_spill] sm:$0xff] %v3051_v17  ;;  %v434_v21 = vshrl.u32 %v3051_v17, 16  ;;  %v437_v11 = vshll.u32 %v3051_v17, 16 }
 0x12e   : > { %v3040_v7 = vadd.f32 %v978_v54, %v825_v55  ;;  %v3042_v62 = vadd.f32 %v1032_v16, %v877_v41  ;;  %3648 = vst [vmem:[#allocation16_spill] sm:$0xff] %v3054_v4  ;;  %v443_v55 = vshll.u32 %v3054_v4, 16 }
 0x130   : > { %3645 = vst [vmem:[#allocation13_spill] sm:$0xff] %v3040_v7 }
 0x131   : > { %3646 = vst [vmem:[#allocation14_spill] sm:$0xff] %v3042_v62  ;;  %v453_v62 = vshll.u32 %v3071_v25, 16 }
 0x132   : > { %v983_v59 = vpop.f32.mrf.mxu0  ;;  %v1037_v40 = vpop.f32.mrf.mxu1 }
 0x133   : > { %v826_v15 = vpop.f32.mrf.mxu2  ;;  %v878_v31 = vpop.f32.mrf.mxu3 }
 0x134   : > { %v827_v35 = vadd.f32 %v826_v15, %v2836_v12  ;;  %v879_v50 = vadd.f32 %v878_v31, %v2838_v32 }
 0x135   : > { %2219 = vmatmul.msk.bf16.gmra.mxu0 %vm612_vm3, %v2674_v28  ;;  %2228 = vmatmul.msk.bf16.gmra.mxu1 %vm612_vm3, %v2674_v28  ;;  %v445_v28 = vrot.slane %v443_v55, 5 }
 0x136   : > { %v3056_v54 = vadd.f32 %v980_v3, %v827_v35  ;;  %v3058_v16 = vadd.f32 %v1034_v58, %v879_v50  ;;  %v447_v3 = vshrl.u32 %v3054_v4, 16  ;;  %v436_v35 = vrot.slane %v434_v21, 4 }
 0x137   : > { %v439_v50 = vrot.slane %v437_v11, 5  ;;  %v455_v11 = vrot.slane %v453_v62, 5 }
 0x138   : > { %3649 = vst [vmem:[#allocation17_spill] sm:$0xff] %v3056_v54  ;;  %2201 = vmatmul.msk.bf16.gmra.mxu2 %vm612_vm3, %v2877_v56  ;;  %2210 = vmatmul.msk.bf16.gmra.mxu3 %vm612_vm3, %v2877_v56  ;;  %v449_v20 = vrot.slane %v447_v3, 4 }
 0x139   : > { %3650 = vst [vmem:[#allocation18_spill] sm:$0xff] %v3058_v16  ;;  %v440_v54 = vor.u32 %v439_v50, %v436_v35  ;;  %v2298_v50 = vld [vmem:[%s3604_s2 + $0x10] sm:$0x3] }
 0x13a   : > { %v985_v12 = vpop.f32.mrf.mxu0  ;;  %v1039_v32 = vpop.f32.mrf.mxu1  ;;  %v450_v4 = vor.u32 %v449_v20, %v445_v28 }
 0x13b   : > { %v829_v41 = vpop.f32.mrf.mxu2  ;;  %v881_v58 = vpop.f32.mrf.mxu3 }
 0x13c   : > { %v830_v15 = vadd.f32 %v829_v41, %v2861_v46  ;;  %v882_v31 = vadd.f32 %v881_v58, %v2863_v9 }
 0x13e   : > { %v3073_v5 = vadd.f32 %v983_v59, %v830_v15  ;;  %v3075_v6 = vadd.f32 %v1037_v40, %v882_v31  ;;  %v441_v59 = vrot.slane %v440_v54, 4  ;;  %v451_v40 = vrot.slane %v450_v4, 4 }
 0x140   : > { %v446_v4 = vsel %vm2540_vm4, %v441_v59, %v445_v28  ;;  %v456_v54 = vsel %vm2540_vm4, %v451_v40, %v455_v11  ;;  %v2289_v28 = vld [vmem:[%s3603_s1 + $0x10] sm:$0x3] }
 0x141   : > { %v1232_v31 = vunpack.c.l.b16 %v446_v4  ;;  %v1233_v35 = vunpack.c.l.b16 %v456_v54  ;;  %v3123_v54 = vld [vmem:[%s2502_s10 + $0x60] sm:$0xff] }
 0x142   : > { %v988_v17 = vpop.f32.mrf.mxu0  ;;  %v1042_v16 = vpop.f32.mrf.mxu1 }
 0x143   : > { %v831_v7 = vpop.f32.mrf.mxu2  ;;  %v883_v46 = vpop.f32.mrf.mxu3 }
 0x144   : > { %v832_v9 = vadd.f32 %v831_v7, %v2872_v52  ;;  %v884_v21 = vadd.f32 %v883_v46, %v2874_v57  ;;  %v2271_v52 = vld [vmem:[%s3603_s1 + $0xe] sm:$0x3]  ;;  %v1823_v46 = vsel %vm637_vm0, %v2289_v28, 0 }
 0x145   : > { %2220 = vmatmul.msk.bf16.gmra.mxu0 %vm612_vm3, %v2724_v36  ;;  %2229 = vmatmul.msk.bf16.gmra.mxu1 %vm612_vm3, %v2724_v36  ;;  %v2280_v57 = vld [vmem:[%s3604_s2 + $0xe] sm:$0x3] }
 0x146   : > { %v3084_v55 = vadd.f32 %v985_v12, %v832_v9  ;;  %v3086_v20 = vadd.f32 %v1039_v32, %v884_v21  ;;  %v1677_v12 = vsel %vm637_vm0, %v2271_v52, 0  ;;  %v1731_v32 = vsel %vm637_vm0, %v2280_v57, 0  ;;  %1832 = vmatpush.bf16.msra.mxu0 %v1823_v46 }
 0x147   : > { %1686 = vmatpush.bf16.msra.mxu2 %v1677_v12  ;;  %1740 = vmatpush.bf16.msra.mxu3 %v1731_v32  ;;  %v1877_v9 = vsel %vm637_vm0, %v2298_v50, 0  ;;  %v3118_v21 = vpack.c.b16 %v1233_v35, %v1232_v31 }
 0x148   : > { %2202 = vmatmul.msk.bf16.gmra.mxu2 %vm612_vm3, %v2928_v18  ;;  %2211 = vmatmul.msk.bf16.gmra.mxu3 %vm612_vm3, %v2928_v18 }
 0x149   : > { %1886 = vmatpush.bf16.msra.mxu1 %v1877_v9 }
 0x14a   : > { %v990_v7 = vpop.f32.mrf.mxu0  ;;  %v1044_v62 = vpop.f32.mrf.mxu1 }
 0x14b   : > { %v834_v3 = vpop.f32.mrf.mxu2  ;;  %v886_v41 = vpop.f32.mrf.mxu3 }
 0x14c   : > { %v835_v58 = vadd.f32 %v834_v3, %v2905_v8  ;;  %v887_v15 = vadd.f32 %v886_v41, %v2907_v14 }
 0x14e   : > { %v3114_v8 = vadd.f32 %v988_v17, %v835_v58  ;;  %v3116_v14 = vadd.f32 %v1042_v16, %v887_v15 }
 0x152   : > { %v993_v59 = vpop.f32.mrf.mxu0  ;;  %v1047_v40 = vpop.f32.mrf.mxu1 }
 0x153   : > { %v836_v11 = vpop.f32.mrf.mxu2  ;;  %v888_v52 = vpop.f32.mrf.mxu3 }
 0x154   : > { %v837_v57 = vadd.f32 %v836_v11, %v2923_v43  ;;  %v889_v4 = vadd.f32 %v888_v52, %v2925_v45 }
 0x155   : > { %2221 = vmatmul.msk.bf16.gmra.mxu0 %vm612_vm3, %v3118_v21  ;;  %2230 = vmatmul.msk.bf16.gmra.mxu1 %vm612_vm3, %v3118_v21 }
 0x156   : > { %v3129_v17 = vadd.f32 %v990_v7, %v837_v57  ;;  %v3131_v16 = vadd.f32 %v1044_v62, %v889_v4 }
 0x158   : > { %2203 = vmatmul.msk.bf16.gmra.mxu2 %vm612_vm3, %v3123_v54  ;;  %2212 = vmatmul.msk.bf16.gmra.mxu3 %vm612_vm3, %v3123_v54 }
 0x15a   : > { %v995_v43 = vpop.f32.mrf.mxu0  ;;  %v1049_v45 = vpop.f32.mrf.mxu1 }
 0x15b   : > { %v839_v12 = vpop.f32.mrf.mxu2  ;;  %v891_v32 = vpop.f32.mrf.mxu3 }
 0x15c   : > { %v840_v3 = vadd.f32 %v839_v12, %v2942_v60  ;;  %v892_v41 = vadd.f32 %v891_v32, %v2944_v42 }
 0x15e   : > { %v3139_v58 = vadd.f32 %v993_v59, %v840_v3  ;;  %v3141_v7 = vadd.f32 %v1047_v40, %v892_v41 }
 0x162   : > { %v1250_v62 = vpop.f32.mrf.mxu0  ;;  %v1304_v15 = vpop.f32.mrf.mxu1 }
 0x163   : > { %v841_v31 = vpop.f32.mrf.mxu2  ;;  %v893_v35 = vpop.f32.mrf.mxu3 }
 0x164   : > { %v842_v28 = vadd.f32 %v841_v31, %v2946_v22  ;;  %v894_v50 = vadd.f32 %v893_v35, %v2948_v2 }
 0x165   : > { %2254 = vmatmul.msk.bf16.vlgmr.msrb.gmra.mxu0 %vm612_vm3, %v2769_v49  ;;  %2263 = vmatmul.msk.bf16.vlgmr.msrb.gmra.mxu1 %vm612_vm3, %v2769_v49 }
 0x166   : > { %v3149_v60 = vadd.f32 %v995_v43, %v842_v28  ;;  %v3151_v42 = vadd.f32 %v1049_v45, %v894_v50 }
 0x168   : > { %2232 = vmatmul.msk.bf16.vlgmr.msrb.gmra.mxu2 %vm612_vm3, %v2728_v30  ;;  %2241 = vmatmul.msk.bf16.vlgmr.msrb.gmra.mxu3 %vm612_vm3, %v2728_v30 }
 0x16a   : > { %v1252_v46 = vpop.f32.mrf.mxu0  ;;  %v1306_v22 = vpop.f32.mrf.mxu1 }
 0x16b   : > { %v1104_v9 = vpop.f32.mrf.mxu2  ;;  %v1158_v2 = vpop.f32.mrf.mxu3 }
 0x16c   : > { %v1198_v59 = vadd.f32 %v1104_v9, %v2960_v38  ;;  %v1214_v40 = vadd.f32 %v1158_v2, %v2962_v23 }
 0x16e   : > { %v3159_v11 = vadd.f32 %v1250_v62, %v1198_v59  ;;  %v3161_v49 = vadd.f32 %v1304_v15, %v1214_v40 }
 0x172   : > { %v1255_v52 = vpop.f32.mrf.mxu0  ;;  %v1309_v57 = vpop.f32.mrf.mxu1 }
 0x173   : > { %v1106_v4 = vpop.f32.mrf.mxu2  ;;  %v1160_v43 = vpop.f32.mrf.mxu3 }
 0x174   : > { %v1199_v45 = vadd.f32 %v1106_v4, %v2970_v19  ;;  %v1215_v30 = vadd.f32 %v1160_v43, %v2972_v0 }
 0x175   : > { %2255 = vmatmul.msk.bf16.gmra.mxu0 %vm612_vm3, %v2781_v53  ;;  %2264 = vmatmul.msk.bf16.gmra.mxu1 %vm612_vm3, %v2781_v53 }
 0x176   : > { %v3169_v38 = vadd.f32 %v1252_v46, %v1199_v45  ;;  %v3171_v23 = vadd.f32 %v1306_v22, %v1215_v30 }
 0x178   : > { %2233 = vmatmul.msk.bf16.gmra.mxu2 %vm612_vm3, %v2744_v29  ;;  %2242 = vmatmul.msk.bf16.gmra.mxu3 %vm612_vm3, %v2744_v29 }
 0x17a   : > { %v1257_v12 = vpop.f32.mrf.mxu0  ;;  %v1311_v19 = vpop.f32.mrf.mxu1 }
 0x17b   : > { %v1109_v32 = vpop.f32.mrf.mxu2  ;;  %v1163_v0 = vpop.f32.mrf.mxu3 }
 0x17c   : > { %v1200_v3 = vadd.f32 %v1109_v32, %v2980_v24  ;;  %v1216_v41 = vadd.f32 %v1163_v0, %v2982_v63 }
 0x17e   : > { %v3179_v62 = vadd.f32 %v1255_v52, %v1200_v3  ;;  %v3181_v53 = vadd.f32 %v1309_v57, %v1216_v41 }
 0x182   : > { %v1260_v15 = vpop.f32.mrf.mxu0  ;;  %v1314_v31 = vpop.f32.mrf.mxu1 }
 0x183   : > { %v1111_v35 = vpop.f32.mrf.mxu2  ;;  %v1165_v28 = vpop.f32.mrf.mxu3 }
 0x184   : > { %v1201_v50 = vadd.f32 %v1111_v35, %v2990_v27  ;;  %v1217_v46 = vadd.f32 %v1165_v28, %v2992_v47 }
 0x185   : > { %2256 = vmatmul.msk.bf16.gmra.mxu0 %vm612_vm3, %v2805_v1  ;;  %2265 = vmatmul.msk.bf16.gmra.mxu1 %vm612_vm3, %v2805_v1 }
 0x186   : > { %v3189_v24 = vadd.f32 %v1257_v12, %v1201_v50  ;;  %v3191_v63 = vadd.f32 %v1311_v19, %v1217_v46  ;;  %v3651_v12 = vld [vmem:[#allocation9_spill] sm:$0xff] }
 0x188   : > { %2234 = vmatmul.msk.bf16.gmra.mxu2 %vm612_vm3, %v2762_v51  ;;  %2243 = vmatmul.msk.bf16.gmra.mxu3 %vm612_vm3, %v2762_v51 }
 0x18a   : > { %v1262_v22 = vpop.f32.mrf.mxu0  ;;  %v1316_v27 = vpop.f32.mrf.mxu1 }
 0x18b   : > { %v1114_v9 = vpop.f32.mrf.mxu2  ;;  %v1168_v47 = vpop.f32.mrf.mxu3 }
 0x18c   : > { %v1202_v2 = vadd.f32 %v1114_v9, %v3000_v13  ;;  %v1218_v59 = vadd.f32 %v1168_v47, %v3002_v61  ;;  %v3653_v47 = vld [vmem:[#allocation13_spill] sm:$0xff] }
 0x18e   : > { %v3199_v40 = vadd.f32 %v1260_v15, %v1202_v2  ;;  %v3201_v1 = vadd.f32 %v1314_v31, %v1218_v59  ;;  %v3654_v59 = vld [vmem:[#allocation14_spill] sm:$0xff] }
 0x192   : > { %v1265_v52 = vpop.f32.mrf.mxu0  ;;  %v1319_v57 = vpop.f32.mrf.mxu1 }
 0x193   : > { %v1116_v4 = vpop.f32.mrf.mxu2  ;;  %v1170_v43 = vpop.f32.mrf.mxu3 }
 0x194   : > { %v1203_v45 = vadd.f32 %v1116_v4, %v3010_v44  ;;  %v1219_v30 = vadd.f32 %v1170_v43, %v3012_v26 }
 0x195   : > { %2257 = vmatmul.msk.bf16.gmra.mxu0 %vm612_vm3, %v2841_v33  ;;  %2266 = vmatmul.msk.bf16.gmra.mxu1 %vm612_vm3, %v2841_v33 }
 0x196   : > { %v3209_v13 = vadd.f32 %v1262_v22, %v1203_v45  ;;  %v3211_v61 = vadd.f32 %v1316_v27, %v1219_v30  ;;  %v3652_v22 = vld [vmem:[#allocation10_spill] sm:$0xff] }
 0x198   : > { %2235 = vmatmul.msk.bf16.gmra.mxu2 %vm612_vm3, %v3651_v12  ;;  %2244 = vmatmul.msk.bf16.gmra.mxu3 %vm612_vm3, %v3651_v12 }
 0x19a   : > { %v1267_v19 = vpop.f32.mrf.mxu0  ;;  %v1321_v44 = vpop.f32.mrf.mxu1 }
 0x19b   : > { %v1119_v32 = vpop.f32.mrf.mxu2  ;;  %v1173_v26 = vpop.f32.mrf.mxu3 }
 0x19c   : > { %v1204_v0 = vadd.f32 %v1119_v32, %v3020_v48  ;;  %v1220_v3 = vadd.f32 %v1173_v26, %v3022_v39  ;;  %v3656_v32 = vld [vmem:[#allocation18_spill] sm:$0xff] }
 0x19e   : > { %v3219_v41 = vadd.f32 %v1265_v52, %v1204_v0  ;;  %v3221_v33 = vadd.f32 %v1319_v57, %v1220_v3 }
 0x1a2   : > { %v1270_v15 = vpop.f32.mrf.mxu0  ;;  %v1324_v31 = vpop.f32.mrf.mxu1 }
 0x1a3   : > { %v1121_v35 = vpop.f32.mrf.mxu2  ;;  %v1175_v28 = vpop.f32.mrf.mxu3 }
 0x1a4   : > { %v1205_v50 = vadd.f32 %v1121_v35, %v3030_v10  ;;  %v1221_v46 = vadd.f32 %v1175_v28, %v3032_v34 }
 0x1a5   : > { %2258 = vmatmul.msk.bf16.gmra.mxu0 %vm612_vm3, %v2877_v56  ;;  %2267 = vmatmul.msk.bf16.gmra.mxu1 %vm612_vm3, %v2877_v56 }
 0x1a6   : > { %v3229_v48 = vadd.f32 %v1267_v19, %v1205_v50  ;;  %v3231_v39 = vadd.f32 %v1321_v44, %v1221_v46  ;;  %v3655_v19 = vld [vmem:[#allocation17_spill] sm:$0xff] }
 0x1a8   : > { %2236 = vmatmul.msk.bf16.gmra.mxu2 %vm612_vm3, %v3652_v22  ;;  %2245 = vmatmul.msk.bf16.gmra.mxu3 %vm612_vm3, %v3652_v22 }
 0x1aa   : > { %v1272_v27 = vpop.f32.mrf.mxu0  ;;  %v1326_v10 = vpop.f32.mrf.mxu1 }
 0x1ab   : > { %v1124_v9 = vpop.f32.mrf.mxu2  ;;  %v1178_v34 = vpop.f32.mrf.mxu3 }
 0x1ac   : > { %v1206_v2 = vadd.f32 %v1124_v9, %v3653_v47  ;;  %v1222_v52 = vadd.f32 %v1178_v34, %v3654_v59 }
 0x1ae   : > { %v3239_v57 = vadd.f32 %v1270_v15, %v1206_v2  ;;  %v3241_v56 = vadd.f32 %v1324_v31, %v1222_v52  ;;  %v3657_v15 = vld [vmem:[#allocation11_spill] sm:$0xff] }
 0x1b2   : > { %v1275_v4 = vpop.f32.mrf.mxu0  ;;  %v1329_v43 = vpop.f32.mrf.mxu1 }
 0x1b3   : > { %v1126_v45 = vpop.f32.mrf.mxu2  ;;  %v1180_v30 = vpop.f32.mrf.mxu3 }
 0x1b4   : > { %v1207_v44 = vadd.f32 %v1126_v45, %v3655_v19  ;;  %v1223_v26 = vadd.f32 %v1180_v30, %v3656_v32  ;;  %v3659_v45 = vld [vmem:[#allocation12_spill] sm:$0xff]  ;;  %v3660_v30 = vld [vmem:[#allocation15_spill] sm:$0xff] }
 0x1b5   : > { %2259 = vmatmul.msk.bf16.gmra.mxu0 %vm612_vm3, %v2928_v18  ;;  %2268 = vmatmul.msk.bf16.gmra.mxu1 %vm612_vm3, %v2928_v18  ;;  %v2105_v19 = vrot.slane %v3660_v30, 9 }
 0x1b6   : > { %v3249_v0 = vadd.f32 %v1272_v27, %v1207_v44  ;;  %v3251_v3 = vadd.f32 %v1326_v10, %v1223_v26 }
 0x1b8   : > { %2237 = vmatmul.msk.bf16.gmra.mxu2 %vm612_vm3, %v3657_v15  ;;  %2246 = vmatmul.msk.bf16.gmra.mxu3 %vm612_vm3, %v3657_v15 }
 0x1ba   : > { %v1277_v31 = vpop.f32.mrf.mxu0  ;;  %v1331_v35 = vpop.f32.mrf.mxu1 }
 0x1bb   : > { %v1129_v28 = vpop.f32.mrf.mxu2  ;;  %v1183_v50 = vpop.f32.mrf.mxu3 }
 0x1bc   : > { %v1208_v46 = vadd.f32 %v1129_v28, %v3073_v5  ;;  %v1224_v9 = vadd.f32 %v1183_v50, %v3075_v6  ;;  %v3658_v5 = vld [vmem:[#allocation16_spill] sm:$0xff] }
 0x1bd   : > { %v572_v6 = vrot.slane %v3658_v5, 5 }
 0x1be   : > { %v3259_v34 = vadd.f32 %v1275_v4, %v1208_v46  ;;  %v3261_v18 = vadd.f32 %v1329_v43, %v1224_v9 }
 0x1bf   : > { %v574_v44 = vrot.slane %v572_v6, 4  ;;  %v573_v50 = vsel %vm2670_vm7, %v2105_v19, %v572_v6 }
 0x1c2   : > { %v1280_v27 = vpop.f32.mrf.mxu0  ;;  %v1334_v10 = vpop.f32.mrf.mxu1 }
 0x1c3   : > { %v1131_v47 = vpop.f32.mrf.mxu2  ;;  %v1185_v2 = vpop.f32.mrf.mxu3 }
 0x1c4   : > { %v1209_v59 = vadd.f32 %v1131_v47, %v3084_v55  ;;  %v1225_v52 = vadd.f32 %v1185_v2, %v3086_v20  ;;  %v1378_v2 = vunpack.c.l.b16 %v573_v50 }
 0x1c5   : > { %2260 = vmatmul.msk.bf16.gmra.mxu0 %vm612_vm3, %v3123_v54  ;;  %2269 = vmatmul.msk.bf16.gmra.mxu1 %vm612_vm3, %v3123_v54  ;;  %v575_v54 = vrot.slane %v3071_v25, 5 }
 0x1c6   : > { %v3270_v4 = vadd.f32 %v1277_v31, %v1209_v59  ;;  %v3272_v43 = vadd.f32 %v1331_v35, %v1225_v52  ;;  %v2334_v52 = vld [vmem:[%s2502_s10 + $0x6c] sm:$0xff] }
 0x1c7   : > { %v576_v46 = vsel %vm2670_vm7, %v574_v44, %v575_v54 }
 0x1c8   : > { %2238 = vmatmul.msk.bf16.gmra.mxu2 %vm612_vm3, %v3659_v45  ;;  %2247 = vmatmul.msk.bf16.gmra.mxu3 %vm612_vm3, %v3659_v45  ;;  %v1379_v59 = vunpack.c.l.b16 %v576_v46 }
 0x1ca   : > { %v1282_v55 = vpop.f32.mrf.mxu0  ;;  %v1336_v20 = vpop.f32.mrf.mxu1 }
 0x1cb   : > { %v1134_v32 = vpop.f32.mrf.mxu2  ;;  %v1188_v26 = vpop.f32.mrf.mxu3 }
 0x1cc   : > { %v1210_v31 = vadd.f32 %v1134_v32, %v3114_v8  ;;  %v1226_v35 = vadd.f32 %v1188_v26, %v3116_v14  ;;  %v3293_v32 = vpack.c.b16 %v1379_v59, %v1378_v2  ;;  %v3662_v2 = vld [vmem:[#allocation5_spill] sm:$0xff] }
 0x1ce   : > { %v3286_v9 = vadd.f32 %v1280_v27, %v1210_v31  ;;  %v3288_v47 = vadd.f32 %v1334_v10, %v1226_v35 }
 0x1d2   : > { %v1285_v25 = vpop.f32.mrf.mxu0  ;;  %v1339_v5 = vpop.f32.mrf.mxu1 }
 0x1d3   : > { %v1136_v30 = vpop.f32.mrf.mxu2  ;;  %v1190_v37 = vpop.f32.mrf.mxu3 }
 0x1d4   : > { %v1211_v8 = vadd.f32 %v1136_v30, %v3129_v17  ;;  %v1227_v14 = vadd.f32 %v1190_v37, %v3131_v16 }
 0x1d5   : > { %2261 = vmatmul.msk.bf16.gmra.mxu0 %vm612_vm3, %v2334_v52  ;;  %2270 = vmatmul.msk.bf16.gmra.mxu1 %vm612_vm3, %v2334_v52 }
 0x1d6   : > { %v3297_v27 = vadd.f32 %v1282_v55, %v1211_v8  ;;  %v3299_v10 = vadd.f32 %v1336_v20, %v1227_v14 }
 0x1d8   : > { %2239 = vmatmul.msk.bf16.gmra.mxu2 %vm612_vm3, %v3293_v32  ;;  %2248 = vmatmul.msk.bf16.gmra.mxu3 %vm612_vm3, %v3293_v32 }
 0x1da   : > { %v1287_v6 = vpop.f32.mrf.mxu0  ;;  %v1341_v17 = vpop.f32.mrf.mxu1 }
 0x1db   : > { %v1139_v19 = vpop.f32.mrf.mxu2  ;;  %v1193_v37 = vpop.f32.mrf.mxu3 }
 0x1dc   : > { %v1212_v16 = vadd.f32 %v1139_v19, %v3139_v58  ;;  %v1228_v44 = vadd.f32 %v1193_v37, %v3141_v7 }
 0x1de   : > { %v3307_v54 = vadd.f32 %v1285_v25, %v1212_v16  ;;  %v3309_v55 = vadd.f32 %v1339_v5, %v1228_v44  ;;  %v3663_v16 = vld [vmem:[#allocation8_spill] sm:$0xff] }
 0x1e2   : > { %v1542_v20 = vpop.f32.mrf.mxu0  ;;  %v1596_v26 = vpop.f32.mrf.mxu1 }
 0x1e3   : > { %v1141_v31 = vpop.f32.mrf.mxu2  ;;  %v1195_v35 = vpop.f32.mrf.mxu3 }
 0x1e4   : > { %v1213_v50 = vadd.f32 %v1141_v31, %v3149_v60  ;;  %v1229_v46 = vadd.f32 %v1195_v35, %v3151_v42 }
 0x1e5   : > { %2290 = vmatmul.msk.bf16.vlgmr.msra.gmra.mxu0 %vm612_vm3, %v2744_v29  ;;  %2299 = vmatmul.msk.bf16.vlgmr.msra.gmra.mxu1 %vm612_vm3, %v2744_v29 }
 0x1e6   : > { %v3317_v58 = vadd.f32 %v1287_v6, %v1213_v50  ;;  %v3319_v7 = vadd.f32 %v1341_v17, %v1229_v46 }
 0x1e8   : > { %2272 = vmatmul.msk.bf16.vlgmr.msra.gmra.mxu2 %vm612_vm3, %v3662_v2  ;;  %2281 = vmatmul.msk.bf16.vlgmr.msra.gmra.mxu3 %vm612_vm3, %v3662_v2 }
 0x1ea   : > { %v1544_v59 = vpop.f32.mrf.mxu0  ;;  %v1598_v60 = vpop.f32.mrf.mxu1 }
 0x1eb   : > { %v1396_v52 = vpop.f32.mrf.mxu2  ;;  %v1450_v42 = vpop.f32.mrf.mxu3 }
 0x1ec   : > { %v1490_v25 = vadd.f32 %v1396_v52, %v3159_v11  ;;  %v1506_v5 = vadd.f32 %v1450_v42, %v3161_v49  ;;  %v3664_v42 = vld [vmem:[#allocation3_spill] sm:$0xff] }
 0x1ee   : > { %v3327_v30 = vadd.f32 %v1542_v20, %v1490_v25  ;;  %v3329_v29 = vadd.f32 %v1596_v26, %v1506_v5 }
 0x1f2   : > { %v1547_v8 = vpop.f32.mrf.mxu0  ;;  %v1601_v14 = vpop.f32.mrf.mxu1 }
 0x1f3   : > { %v1398_v6 = vpop.f32.mrf.mxu2  ;;  %v1452_v17 = vpop.f32.mrf.mxu3 }
 0x1f4   : > { %v1491_v19 = vadd.f32 %v1398_v6, %v3169_v38  ;;  %v1507_v37 = vadd.f32 %v1452_v17, %v3171_v23 }
 0x1f5   : > { %2291 = vmatmul.msk.bf16.gmra.mxu0 %vm612_vm3, %v2762_v51  ;;  %2300 = vmatmul.msk.bf16.gmra.mxu1 %vm612_vm3, %v2762_v51 }
 0x1f6   : > { %v3337_v11 = vadd.f32 %v1544_v59, %v1491_v19  ;;  %v3339_v49 = vadd.f32 %v1598_v60, %v1507_v37 }
 0x1f8   : > { %2273 = vmatmul.msk.bf16.gmra.mxu2 %vm612_vm3, %v3663_v16  ;;  %2282 = vmatmul.msk.bf16.gmra.mxu3 %vm612_vm3, %v3663_v16 }
 0x1fa   : > { %v1549_v44 = vpop.f32.mrf.mxu0  ;;  %v1603_v38 = vpop.f32.mrf.mxu1 }
 0x1fb   : > { %v1401_v20 = vpop.f32.mrf.mxu2  ;;  %v1455_v23 = vpop.f32.mrf.mxu3 }
 0x1fc   : > { %v1492_v26 = vadd.f32 %v1401_v20, %v3179_v62  ;;  %v1508_v31 = vadd.f32 %v1455_v23, %v3181_v53  ;;  %v3665_v20 = vld [vmem:[#allocation4_spill] sm:$0xff] }
 0x1fe   : > { %v3347_v35 = vadd.f32 %v1547_v8, %v1492_v26  ;;  %v3349_v51 = vadd.f32 %v1601_v14, %v1508_v31 }
 0x202   : > { %v1552_v50 = vpop.f32.mrf.mxu0  ;;  %v1606_v46 = vpop.f32.mrf.mxu1 }
 0x203   : > { %v1403_v2 = vpop.f32.mrf.mxu2  ;;  %v1457_v59 = vpop.f32.mrf.mxu3 }
 0x204   : > { %v1493_v60 = vadd.f32 %v1403_v2, %v3189_v24  ;;  %v1509_v52 = vadd.f32 %v1457_v59, %v3191_v63 }
 0x205   : > { %2292 = vmatmul.msk.bf16.gmra.mxu0 %vm612_vm3, %v3651_v12  ;;  %2301 = vmatmul.msk.bf16.gmra.mxu1 %vm612_vm3, %v3651_v12 }
 0x206   : > { %v3357_v62 = vadd.f32 %v1549_v44, %v1493_v60  ;;  %v3359_v53 = vadd.f32 %v1603_v38, %v1509_v52 }
 0x208   : > { %2274 = vmatmul.msk.bf16.gmra.mxu2 %vm612_vm3, %v3664_v42  ;;  %2283 = vmatmul.msk.bf16.gmra.mxu3 %vm612_vm3, %v3664_v42 }
 0x20a   : > { %v1554_v25 = vpop.f32.mrf.mxu0  ;;  %v1608_v24 = vpop.f32.mrf.mxu1 }
 0x20b   : > { %v1406_v5 = vpop.f32.mrf.mxu2  ;;  %v1460_v63 = vpop.f32.mrf.mxu3 }
 0x20c   : > { %v1494_v8 = vadd.f32 %v1406_v5, %v3199_v40  ;;  %v1510_v14 = vadd.f32 %v1460_v63, %v3201_v1 }
 0x20e   : > { %v3367_v6 = vadd.f32 %v1552_v50, %v1494_v8  ;;  %v3369_v12 = vadd.f32 %v1606_v46, %v1510_v14 }
 0x212   : > { %v1557_v17 = vpop.f32.mrf.mxu0  ;;  %v1611_v19 = vpop.f32.mrf.mxu1 }
 0x213   : > { %v1408_v37 = vpop.f32.mrf.mxu2  ;;  %v1462_v16 = vpop.f32.mrf.mxu3 }
 0x214   : > { %v1495_v44 = vadd.f32 %v1408_v37, %v3209_v13  ;;  %v1511_v38 = vadd.f32 %v1462_v16, %v3211_v61 }
 0x215   : > { %2293 = vmatmul.msk.bf16.gmra.mxu0 %vm612_vm3, %v3652_v22  ;;  %2302 = vmatmul.msk.bf16.gmra.mxu1 %vm612_vm3, %v3652_v22 }
 0x216   : > { %v3377_v40 = vadd.f32 %v1554_v25, %v1495_v44  ;;  %v3379_v1 = vadd.f32 %v1608_v24, %v1511_v38  ;;  %v3666_v24 = vld [vmem:[#allocation7_spill] sm:$0xff] }
 0x218   : > { %2275 = vmatmul.msk.bf16.gmra.mxu2 %vm612_vm3, %v3665_v20  ;;  %2284 = vmatmul.msk.bf16.gmra.mxu3 %vm612_vm3, %v3665_v20 }
 0x21a   : > { %v1559_v23 = vpop.f32.mrf.mxu0  ;;  %v1613_v13 = vpop.f32.mrf.mxu1 }
 0x21b   : > { %v1411_v26 = vpop.f32.mrf.mxu2  ;;  %v1465_v61 = vpop.f32.mrf.mxu3 }
 0x21c   : > { %v1496_v31 = vadd.f32 %v1411_v26, %v3219_v41  ;;  %v1512_v50 = vadd.f32 %v1465_v61, %v3221_v33 }
 0x21e   : > { %v3387_v46 = vadd.f32 %v1557_v17, %v1496_v31  ;;  %v3389_v22 = vadd.f32 %v1611_v19, %v1512_v50 }
 0x222   : > { %v1562_v2 = vpop.f32.mrf.mxu0  ;;  %v1616_v59 = vpop.f32.mrf.mxu1 }
 0x223   : > { %v1413_v60 = vpop.f32.mrf.mxu2  ;;  %v1467_v52 = vpop.f32.mrf.mxu3 }
 0x224   : > { %v1497_v42 = vadd.f32 %v1413_v60, %v3229_v48  ;;  %v1513_v25 = vadd.f32 %v1467_v52, %v3231_v39 }
 0x225   : > { %2294 = vmatmul.msk.bf16.gmra.mxu0 %vm612_vm3, %v3657_v15  ;;  %2303 = vmatmul.msk.bf16.gmra.mxu1 %vm612_vm3, %v3657_v15 }
 0x226   : > { %v3397_v41 = vadd.f32 %v1559_v23, %v1497_v42  ;;  %v3399_v33 = vadd.f32 %v1613_v13, %v1513_v25  ;;  %v235_v23 = vld [vmem:[%s2502_s10 + $0x6c] sm:$0xf] }
 0x227   : > { %v458_v31 = vshrl.u32 %v235_v23, 16  ;;  %v461_v50 = vshll.u32 %v235_v23, 16 }
 0x228   : > { %2276 = vmatmul.msk.bf16.gmra.mxu2 %vm612_vm3, %v3666_v24  ;;  %2285 = vmatmul.msk.bf16.gmra.mxu3 %vm612_vm3, %v3666_v24 }
 0x229   : > { %v463_v25 = vrot.slane %v461_v50, 5 }
 0x22a   : > { %v1564_v5 = vpop.f32.mrf.mxu0  ;;  %v1618_v48 = vpop.f32.mrf.mxu1 }
 0x22b   : > { %v1416_v63 = vpop.f32.mrf.mxu2  ;;  %v1470_v39 = vpop.f32.mrf.mxu3 }
 0x22c   : > { %v1498_v8 = vadd.f32 %v1416_v63, %v3239_v57  ;;  %v1514_v14 = vadd.f32 %v1470_v39, %v3241_v56 }
 0x22e   : > { %v3407_v15 = vadd.f32 %v1562_v2, %v1498_v8  ;;  %v3409_v17 = vadd.f32 %v1616_v59, %v1514_v14  ;;  %v237_v8 = vld [vmem:[%s2502_s10 + $0x74] sm:$0x1] }
 0x232   : > { %v1567_v19 = vpop.f32.mrf.mxu0  ;;  %v1621_v37 = vpop.f32.mrf.mxu1 }
 0x233   : > { %v1418_v16 = vpop.f32.mrf.mxu2  ;;  %v1472_v44 = vpop.f32.mrf.mxu3 }
 0x234   : > { %v1499_v38 = vadd.f32 %v1418_v16, %v3249_v0  ;;  %v1515_v20 = vadd.f32 %v1472_v44, %v3251_v3  ;;  %v236_v3 = vld [vmem:[%s2502_s10 + $0x70] sm:$0xf]  ;;  %s2094_s10 = sshll.u32 %s3681_s12, 5 }
 0x235   : > { %2295 = vmatmul.msk.bf16.gmra.mxu0 %vm612_vm3, %v3659_v45  ;;  %2304 = vmatmul.msk.bf16.gmra.mxu1 %vm612_vm3, %v3659_v45  ;;  %v467_v59 = vshll.u32 %v236_v3, 16  ;;  %v471_v60 = vshrl.u32 %v236_v3, 16  ;;  %v579_v39 = vrot.slane %v236_v3, 5  ;;  %s204_s24 = sadd.s32 %s2095_s23, %s2094_s10 }
 0x236   : > { %v3417_v57 = vadd.f32 %v1564_v5, %v1499_v38  ;;  %v3419_v56 = vadd.f32 %v1618_v48, %v1515_v20  ;;  %v2106_v38 = vrot.slane %v235_v23, 9  ;;  %s2096_s25 = sshll.u32 %s204_s24, 3 }
 0x237   : > { %v469_v24 = vrot.slane %v467_v59, 5  ;;  %v473_v5 = vrot.slane %v471_v60, 4  ;;  %v581_v20 = vrot.slane %v579_v39, 4  ;;  %s3491_s28 = scalar_lea.vmem %s3605_s3, %s2096_s25 }
 0x238   : > { %2277 = vmatmul.msk.bf16.gmra.mxu2 %vm612_vm3, %v2724_v36  ;;  %2286 = vmatmul.msk.bf16.gmra.mxu3 %vm612_vm3, %v2724_v36  ;;  %v460_v36 = vrot.slane %v458_v31, 4  ;;  %v580_v23 = vsel %vm2670_vm7, %v2106_v38, %v579_v39 }
 0x239   : > { %v1816_v60 = vunpack.c.l.b16 %v580_v23 }
 0x23a   : > { %v1569_v0 = vpop.f32.mrf.mxu0  ;;  %v1623_v13 = vpop.f32.mrf.mxu1  ;;  %v464_v44 = vor.u32 %v463_v25, %v460_v36 }
 0x23b   : > { %v1421_v26 = vpop.f32.mrf.mxu2  ;;  %v1475_v61 = vpop.f32.mrf.mxu3 }
 0x23c   : > { %v1500_v45 = vadd.f32 %v1421_v26, %v3259_v34  ;;  %v1516_v2 = vadd.f32 %v1475_v61, %v3261_v18  ;;  %v582_v26 = vrot.slane %v237_v8, 5 }
 0x23e   : > { %v3429_v52 = vadd.f32 %v1567_v19, %v1500_v45  ;;  %v3431_v42 = vadd.f32 %v1621_v37, %v1516_v2  ;;  %v474_v19 = vor.u32 %v473_v5, %v469_v24  ;;  %v477_v37 = vshll.u32 %v237_v8, 16 }
 0x240   : > { %v475_v50 = vrot.slane %v474_v19, 4 }
 0x242   : > { %v1572_v48 = vpop.f32.mrf.mxu0  ;;  %v1626_v63 = vpop.f32.mrf.mxu1 }
 0x243   : > { %v1423_v14 = vpop.f32.mrf.mxu2  ;;  %v1477_v16 = vpop.f32.mrf.mxu3 }
 0x244   : > { %v1501_v34 = vadd.f32 %v1423_v14, %v3270_v4  ;;  %v1517_v18 = vadd.f32 %v1477_v16, %v3272_v43  ;;  %v465_v4 = vrot.slane %v464_v44, 4 }
 0x245   : > { %2296 = vmatmul.msk.bf16.gmra.mxu0 %vm612_vm3, %v3293_v32  ;;  %2305 = vmatmul.msk.bf16.gmra.mxu1 %vm612_vm3, %v3293_v32  ;;  %v479_v32 = vrot.slane %v477_v37, 5 }
 0x246   : > { %v3440_v3 = vadd.f32 %v1569_v0, %v1501_v34  ;;  %v3442_v61 = vadd.f32 %v1623_v13, %v1517_v18  ;;  %v583_v0 = vsel %vm2670_vm7, %v581_v20, %v582_v26  ;;  %v470_v25 = vsel %vm2540_vm4, %v465_v4, %v469_v24 }
 0x247   : > { %v1817_v36 = vunpack.c.l.b16 %v583_v0  ;;  %v480_v5 = vsel %vm2540_vm4, %v475_v50, %v479_v32  ;;  %v1670_v28 = vunpack.c.l.b16 %v470_v25 }
 0x248   : > { %2278 = vmatmul.msk.bf16.gmra.mxu2 %vm612_vm3, %v3118_v21  ;;  %2287 = vmatmul.msk.bf16.gmra.mxu3 %vm612_vm3, %v3118_v21  ;;  %v1671_v14 = vunpack.c.l.b16 %v480_v5 }
 0x249   : > { %v1818_v16 = vpack.c.b16 %v1817_v36, %v1816_v60 }
 0x24a   : > { %v1574_v43 = vpop.f32.mrf.mxu0  ;;  %v1628_v31 = vpop.f32.mrf.mxu1  ;;  %v1672_v37 = vpack.c.b16 %v1671_v14, %v1670_v28 }
 0x24b   : > { %v1426_v45 = vpop.f32.mrf.mxu2  ;;  %v1480_v13 = vpop.f32.mrf.mxu3 }
 0x24c   : > { %v1502_v2 = vadd.f32 %v1426_v45, %v3286_v9  ;;  %v1518_v59 = vadd.f32 %v1480_v13, %v3288_v47 }
 0x24e   : > { %v3458_v8 = vadd.f32 %v1572_v48, %v1502_v2  ;;  %v3460_v39 = vadd.f32 %v1626_v63, %v1518_v59 }
 0x252   : > { %v1577_v44 = vpop.f32.mrf.mxu0  ;;  %v1631_v34 = vpop.f32.mrf.mxu1 }
 0x253   : > { %v1428_v9 = vpop.f32.mrf.mxu2  ;;  %v1482_v18 = vpop.f32.mrf.mxu3 }
 0x254   : > { %v1503_v47 = vadd.f32 %v1428_v9, %v3297_v27  ;;  %v1519_v19 = vadd.f32 %v1482_v18, %v3299_v10 }
 0x255   : > { %2297 = vmatmul.msk.bf16.gmra.mxu0 %vm612_vm3, %v1818_v16  ;;  %2306 = vmatmul.msk.bf16.gmra.mxu1 %vm612_vm3, %v1818_v16 }
 0x256   : > { %v3466_v24 = vadd.f32 %v1574_v43, %v1503_v47  ;;  %v3468_v48 = vadd.f32 %v1628_v31, %v1519_v19 }
 0x258   : > { %2279 = vmatmul.msk.bf16.gmra.mxu2 %vm612_vm3, %v1672_v37  ;;  %2288 = vmatmul.msk.bf16.gmra.mxu3 %vm612_vm3, %v1672_v37 }
 0x25a   : > { %v1579_v63 = vpop.f32.mrf.mxu0  ;;  %v1633_v38 = vpop.f32.mrf.mxu1 }
 0x25b   : > { %v1431_v27 = vpop.f32.mrf.mxu2  ;;  %v1485_v20 = vpop.f32.mrf.mxu3 }
 0x25c   : > { %v1504_v10 = vadd.f32 %v1431_v27, %v3307_v54  ;;  %v1520_v26 = vadd.f32 %v1485_v20, %v3309_v55 }
 0x25e   : > { %v3474_v4 = vadd.f32 %v1577_v44, %v1504_v10  ;;  %v3476_v43 = vadd.f32 %v1631_v34, %v1520_v26 }
 0x262   : > { %v1834_v31 = vpop.f32.mrf.mxu0  ;;  %v1888_v50 = vpop.f32.mrf.mxu1 }
 0x263   : > { %v1433_v32 = vpop.f32.mrf.mxu2  ;;  %v1487_v23 = vpop.f32.mrf.mxu3 }
 0x264   : > { %v1505_v0 = vadd.f32 %v1433_v32, %v3317_v58  ;;  %v1521_v45 = vadd.f32 %v1487_v23, %v3319_v7 }
 0x266   : > { %v3482_v13 = vadd.f32 %v1579_v63, %v1505_v0  ;;  %v3484_v2 = vadd.f32 %v1633_v38, %v1521_v45 }
 0x26a   : > { %v1836_v54 = vpop.f32.mrf.mxu0  ;;  %v1890_v55 = vpop.f32.mrf.mxu1 }
 0x26b   : > { %v1688_v59 = vpop.f32.mrf.mxu2  ;;  %v1742_v60 = vpop.f32.mrf.mxu3 }
 0x26c   : > { %v1782_v36 = vadd.f32 %v1688_v59, %v3327_v30  ;;  %v1798_v21 = vadd.f32 %v1742_v60, %v3329_v29 }
 0x26e   : > { %v1928_v58 = vadd.f32 %v1834_v31, %v1782_v36  ;;  %v1944_v7 = vadd.f32 %v1888_v50, %v1798_v21 }
 0x270   : > { %1960 = vst.msk [vmem:[%s3491_s28] sm:$0xff] %vm612_vm3, %v1928_v58 }
 0x271   : > { %2307 = vst.msk [vmem:[%s3491_s28 + $0x10] sm:$0xff] %vm612_vm3, %v1944_v7 }
 0x272   : > { %v1839_v25 = vpop.f32.mrf.mxu0  ;;  %v1893_v5 = vpop.f32.mrf.mxu1 }
 0x273   : > { %v1690_v30 = vpop.f32.mrf.mxu2  ;;  %v1744_v29 = vpop.f32.mrf.mxu3 }
 0x274   : > { %v1783_v28 = vadd.f32 %v1690_v30, %v3337_v11  ;;  %v1799_v14 = vadd.f32 %v1744_v29, %v3339_v49 }
 0x276   : > { %v1929_v16 = vadd.f32 %v1836_v54, %v1783_v28  ;;  %v1945_v44 = vadd.f32 %v1890_v55, %v1799_v14 }
 0x278   : > { %1961 = vst.msk [vmem:[%s3491_s28 + $0x8] sm:$0xff] %vm612_vm3, %v1929_v16 }
 0x279   : > { %2308 = vst.msk [vmem:[%s3491_s28 + $0x18] sm:$0xff] %vm612_vm3, %v1945_v44 }
 0x27a   : > { %v1841_v34 = vpop.f32.mrf.mxu0  ;;  %v1895_v9 = vpop.f32.mrf.mxu1 }
 0x27b   : > { %v1693_v18 = vpop.f32.mrf.mxu2  ;;  %v1747_v47 = vpop.f32.mrf.mxu3 }
 0x27c   : > { %v1784_v19 = vadd.f32 %v1693_v18, %v3347_v35  ;;  %v1800_v37 = vadd.f32 %v1747_v47, %v3349_v51 }
 0x27e   : > { %v1930_v63 = vadd.f32 %v1839_v25, %v1784_v19  ;;  %v1946_v11 = vadd.f32 %v1893_v5, %v1800_v37 }
 0x280   : > { %1962 = vst.msk [vmem:[%s3491_s28 + $0x20] sm:$0xff] %vm612_vm3, %v1930_v63 }
 0x281   : > { %2309 = vst.msk [vmem:[%s3491_s28 + $0x30] sm:$0xff] %vm612_vm3, %v1946_v11 }
 0x282   : > { %v1844_v49 = vpop.f32.mrf.mxu0  ;;  %v1898_v38 = vpop.f32.mrf.mxu1 }
 0x283   : > { %v1695_v27 = vpop.f32.mrf.mxu2  ;;  %v1749_v20 = vpop.f32.mrf.mxu3 }
 0x284   : > { %v1785_v10 = vadd.f32 %v1695_v27, %v3357_v62  ;;  %v1801_v26 = vadd.f32 %v1749_v20, %v3359_v53 }
 0x286   : > { %v1931_v31 = vadd.f32 %v1841_v34, %v1785_v10  ;;  %v1947_v35 = vadd.f32 %v1895_v9, %v1801_v26 }
 0x288   : > { %1963 = vst.msk [vmem:[%s3491_s28 + $0x28] sm:$0xff] %vm612_vm3, %v1931_v31 }
 0x289   : > { %2310 = vst.msk [vmem:[%s3491_s28 + $0x38] sm:$0xff] %vm612_vm3, %v1947_v35 }
 0x28a   : > { %v1846_v51 = vpop.f32.mrf.mxu0  ;;  %v1900_v50 = vpop.f32.mrf.mxu1 }
 0x28b   : > { %v1698_v32 = vpop.f32.mrf.mxu2  ;;  %v1752_v23 = vpop.f32.mrf.mxu3 }
 0x28c   : > { %v1786_v0 = vadd.f32 %v1698_v32, %v3367_v6  ;;  %v1802_v45 = vadd.f32 %v1752_v23, %v3369_v12 }
 0x28e   : > { %v1932_v54 = vadd.f32 %v1844_v49, %v1786_v0  ;;  %v1948_v62 = vadd.f32 %v1898_v38, %v1802_v45 }
 0x290   : > { %1964 = vst.msk [vmem:[%s3491_s28 + $0x40] sm:$0xff] %vm612_vm3, %v1932_v54 }
 0x291   : > { %2311 = vst.msk [vmem:[%s3491_s28 + $0x50] sm:$0xff] %vm612_vm3, %v1948_v62 }
 0x292   : > { %v1849_v53 = vpop.f32.mrf.mxu0  ;;  %v1903_v55 = vpop.f32.mrf.mxu1 }
 0x293   : > { %v1700_v59 = vpop.f32.mrf.mxu2  ;;  %v1754_v60 = vpop.f32.mrf.mxu3 }
 0x294   : > { %v1787_v36 = vadd.f32 %v1700_v59, %v3377_v40  ;;  %v1803_v21 = vadd.f32 %v1754_v60, %v3379_v1 }
 0x296   : > { %v1933_v58 = vadd.f32 %v1846_v51, %v1787_v36  ;;  %v1949_v6 = vadd.f32 %v1900_v50, %v1803_v21 }
 0x298   : > { %1965 = vst.msk [vmem:[%s3491_s28 + $0x48] sm:$0xff] %vm612_vm3, %v1933_v58 }
 0x299   : > { %2312 = vst.msk [vmem:[%s3491_s28 + $0x58] sm:$0xff] %vm612_vm3, %v1949_v6 }
 0x29a   : > { %v1851_v12 = vpop.f32.mrf.mxu0  ;;  %v1905_v7 = vpop.f32.mrf.mxu1 }
 0x29b   : > { %v1703_v25 = vpop.f32.mrf.mxu2  ;;  %v1757_v5 = vpop.f32.mrf.mxu3 }
 0x29c   : > { %v1788_v30 = vadd.f32 %v1703_v25, %v3387_v46  ;;  %v1804_v29 = vadd.f32 %v1757_v5, %v3389_v22 }
 0x29e   : > { %v1934_v28 = vadd.f32 %v1849_v53, %v1788_v30  ;;  %v1950_v40 = vadd.f32 %v1903_v55, %v1804_v29 }
 0x2a0   : > { %1966 = vst.msk [vmem:[%s3491_s28 + $0x60] sm:$0xff] %vm612_vm3, %v1934_v28 }
 0x2a1   : > { %2313 = vst.msk [vmem:[%s3491_s28 + $0x70] sm:$0xff] %vm612_vm3, %v1950_v40 }
 0x2a2   : > { %v1854_v1 = vpop.f32.mrf.mxu0  ;;  %v1908_v14 = vpop.f32.mrf.mxu1 }
 0x2a3   : > { %v1705_v16 = vpop.f32.mrf.mxu2  ;;  %v1759_v44 = vpop.f32.mrf.mxu3 }
 0x2a4   : > { %v1789_v34 = vadd.f32 %v1705_v16, %v3397_v41  ;;  %v1805_v9 = vadd.f32 %v1759_v44, %v3399_v33 }
 0x2a6   : > { %v1935_v18 = vadd.f32 %v1851_v12, %v1789_v34  ;;  %v1951_v46 = vadd.f32 %v1905_v7, %v1805_v9 }
 0x2a8   : > { %1967 = vst.msk [vmem:[%s3491_s28 + $0x68] sm:$0xff] %vm612_vm3, %v1935_v18 }
 0x2a9   : > { %2314 = vst.msk [vmem:[%s3491_s28 + $0x78] sm:$0xff] %vm612_vm3, %v1951_v46 }
 0x2aa   : > { %v1856_v22 = vpop.f32.mrf.mxu0  ;;  %v1910_v47 = vpop.f32.mrf.mxu1 }
 0x2ab   : > { %v1708_v19 = vpop.f32.mrf.mxu2  ;;  %v1762_v37 = vpop.f32.mrf.mxu3 }
 0x2ac   : > { %v1790_v63 = vadd.f32 %v1708_v19, %v3407_v15  ;;  %v1806_v11 = vadd.f32 %v1762_v37, %v3409_v17 }
 0x2ae   : > { %v1936_v49 = vadd.f32 %v1854_v1, %v1790_v63  ;;  %v1952_v41 = vadd.f32 %v1908_v14, %v1806_v11 }
 0x2b0   : > { %1968 = vst.msk [vmem:[%s3491_s28 + $0x80] sm:$0xff] %vm612_vm3, %v1936_v49 }
 0x2b1   : > { %2315 = vst.msk [vmem:[%s3491_s28 + $0x90] sm:$0xff] %vm612_vm3, %v1952_v41 }
 0x2b2   : > { %v1859_v33 = vpop.f32.mrf.mxu0  ;;  %v1913_v38 = vpop.f32.mrf.mxu1 }
 0x2b3   : > { %v1710_v27 = vpop.f32.mrf.mxu2  ;;  %v1764_v20 = vpop.f32.mrf.mxu3 }
 0x2b4   : > { %v1791_v10 = vadd.f32 %v1710_v27, %v3417_v57  ;;  %v1807_v26 = vadd.f32 %v1764_v20, %v3419_v56 }
 0x2b6   : > { %v1937_v31 = vadd.f32 %v1856_v22, %v1791_v10  ;;  %v1953_v15 = vadd.f32 %v1910_v47, %v1807_v26 }
 0x2b8   : > { %1969 = vst.msk [vmem:[%s3491_s28 + $0x88] sm:$0xff] %vm612_vm3, %v1937_v31 }
 0x2b9   : > { %2316 = vst.msk [vmem:[%s3491_s28 + $0x98] sm:$0xff] %vm612_vm3, %v1953_v15 }
 0x2ba   : > { %v1861_v32 = vpop.f32.mrf.mxu0  ;;  %v1915_v23 = vpop.f32.mrf.mxu1 }
 0x2bb   : > { %v1713_v17 = vpop.f32.mrf.mxu2  ;;  %v1767_v35 = vpop.f32.mrf.mxu3 }
 0x2bc   : > { %v1792_v51 = vadd.f32 %v1713_v17, %v3429_v52  ;;  %v1808_v50 = vadd.f32 %v1767_v35, %v3431_v42 }
 0x2be   : > { %v1938_v0 = vadd.f32 %v1859_v33, %v1792_v51  ;;  %v1954_v57 = vadd.f32 %v1913_v38, %v1808_v50 }
 0x2c0   : > { %1970 = vst.msk [vmem:[%s3491_s28 + $0xa0] sm:$0xff] %vm612_vm3, %v1938_v0 }
 0x2c1   : > { %2317 = vst.msk [vmem:[%s3491_s28 + $0xb0] sm:$0xff] %vm612_vm3, %v1954_v57 }
 0x2c2   : > { %v1864_v42 = vpop.f32.mrf.mxu0  ;;  %v1918_v55 = vpop.f32.mrf.mxu1 }
 0x2c3   : > { %v1715_v56 = vpop.f32.mrf.mxu2  ;;  %v1769_v45 = vpop.f32.mrf.mxu3 }
 0x2c4   : > { %v1793_v54 = vadd.f32 %v1715_v56, %v3440_v3  ;;  %v1809_v62 = vadd.f32 %v1769_v45, %v3442_v61 }
 0x2c6   : > { %v1939_v52 = vadd.f32 %v1861_v32, %v1793_v54  ;;  %v1955_v53 = vadd.f32 %v1915_v23, %v1809_v62 }
 0x2c8   : > { %1971 = vst.msk [vmem:[%s3491_s28 + $0xa8] sm:$0xff] %vm612_vm3, %v1939_v52 }
 0x2c9   : > { %2318 = vst.msk [vmem:[%s3491_s28 + $0xb8] sm:$0xff] %vm612_vm3, %v1955_v53 }
 0x2ca   : > { %v1866_v61 = vpop.f32.mrf.mxu0  ;;  %v1920_v6 = vpop.f32.mrf.mxu1 }
 0x2cb   : > { %v1718_v59 = vpop.f32.mrf.mxu2  ;;  %v1772_v60 = vpop.f32.mrf.mxu3 }
 0x2cc   : > { %v1794_v36 = vadd.f32 %v1718_v59, %v3458_v8  ;;  %v1810_v21 = vadd.f32 %v1772_v60, %v3460_v39 }
 0x2ce   : > { %v1940_v3 = vadd.f32 %v1864_v42, %v1794_v36  ;;  %v1956_v58 = vadd.f32 %v1918_v55, %v1810_v21 }
 0x2d0   : > { %1972 = vst.msk [vmem:[%s3491_s28 + $0xc0] sm:$0xff] %vm612_vm3, %v1940_v3 }
 0x2d1   : > { %2319 = vst.msk [vmem:[%s3491_s28 + $0xd0] sm:$0xff] %vm612_vm3, %v1956_v58 }
 0x2d2   : > { %v1869_v39 = vpop.f32.mrf.mxu0  ;;  %v1923_v29 = vpop.f32.mrf.mxu1 }
 0x2d3   : > { %v1720_v12 = vpop.f32.mrf.mxu2  ;;  %v1774_v7 = vpop.f32.mrf.mxu3 }
 0x2d4   : > { %v1795_v25 = vadd.f32 %v1720_v12, %v3466_v24  ;;  %v1811_v5 = vadd.f32 %v1774_v7, %v3468_v48 }
 0x2d6   : > { %v1941_v30 = vadd.f32 %v1866_v61, %v1795_v25  ;;  %v1957_v8 = vadd.f32 %v1920_v6, %v1811_v5 }
 0x2d8   : > { %1973 = vst.msk [vmem:[%s3491_s28 + $0xc8] sm:$0xff] %vm612_vm3, %v1941_v30 }
 0x2d9   : > { %2320 = vst.msk [vmem:[%s3491_s28 + $0xd8] sm:$0xff] %vm612_vm3, %v1957_v8 }
 0x2da   : > { %v1871_v18 = vpop.f32.mrf.mxu0  ;;  %v1925_v46 = vpop.f32.mrf.mxu1 }
 0x2db   : > { %v1723_v28 = vpop.f32.mrf.mxu2  ;;  %v1777_v40 = vpop.f32.mrf.mxu3 }
 0x2dc   : > { %v1796_v1 = vadd.f32 %v1723_v28, %v3474_v4  ;;  %v1812_v14 = vadd.f32 %v1777_v40, %v3476_v43 }
 0x2de   : > { %v1942_v16 = vadd.f32 %v1869_v39, %v1796_v1  ;;  %v1958_v24 = vadd.f32 %v1923_v29, %v1812_v14 }
 0x2e0   : > { %1974 = vst.msk [vmem:[%s3491_s28 + $0xe0] sm:$0xff] %vm612_vm3, %v1942_v16 }
 0x2e1   : > { %2321 = vst.msk [vmem:[%s3491_s28 + $0xf0] sm:$0xff] %vm612_vm3, %v1958_v24 }
 0x2e3   : > { %v1725_v48 = vpop.f32.mrf.mxu2  ;;  %v1779_v44 = vpop.f32.mrf.mxu3 }
 0x2e4   : > { %v1797_v34 = vadd.f32 %v1725_v48, %v3482_v13  ;;  %v1813_v9 = vadd.f32 %v1779_v44, %v3484_v2 }
 0x2e6   : > { %v1943_v22 = vadd.f32 %v1871_v18, %v1797_v34  ;;  %v1959_v47 = vadd.f32 %v1925_v46, %v1813_v9 }
 0x2e8   : > { %1975 = vst.msk [vmem:[%s3491_s28 + $0xe8] sm:$0xff] %vm612_vm3, %v1943_v22 }
 0x2e9   : > { %2322 = vst.msk [vmem:[%s3491_s28 + $0xf8] sm:$0xff] %vm612_vm3, %v1959_v47 }
 0x2ea PF: > { %s13_s16 = sadd.s32 1, %s2417_s16   ;;  %s3668_s12 = smov %s2409_s14 }
 0x2eb   : > { %p10_p7 = scmp.ge.s32.totalorder %s13_s16, 6   ;;  %s3669_s13 = smov %s2413_s15 }
 0x2ec   : > { %s3670_s14 = smov %s3673_s17  ;;  %s3671_s15 = smov %s3677_s18 }
 0x2ed   :  { %12 = sbr.rel (!%p10_p7) target bundleno = 3 (0x3), region = 79 }

</bundles_post_ra>
